<compile_context>
chip_gen: v7x
topology: tpu7x:2x2x1
jax: 0.10.0
libtpu: 0.0.40
codegen_flags: <defaults>
</compile_context>

<pallas_src>
import functools

import jax
import jax.numpy as jnp
from jax.experimental import pallas as pl
from jax.experimental.pallas import tpu as pltpu

_VMEM_LIMIT = 32 * 1024 * 1024  # explicit: v5e scoped default is only 16 MiB


def _round_up(x, m):
    return (x + m - 1) // m * m


def _choose_tiles(n):
    """Pick (n_pad, row_tile, k_tile) for the node dimension."""
    n_pad = _round_up(n, 256)
    # Reduction tile: multiple of 256 (MXU-native K on v6e/v7x), up to 512.
    k_tile = 512 if n_pad % 512 == 0 else 256
    # Row tile: 512 only if that still leaves >= 2 row tiles (v7x megacore).
    row_tile = 512 if (n_pad % 512 == 0 and n_pad // 512 >= 2) else 256
    return n_pad, row_tile, k_tile


# ---------------------------------------------------------------------------
# Kernel 1: fused GCN layer   H = act(A_hat @ (X @ W) + b)
# grid = (row tiles, k/reduction tiles); f32 accumulator in VMEM scratch.
# W stays resident (constant index_map); X@W is recomputed per row tile and
# hides under the HBM-bound A_hat stream.
# ---------------------------------------------------------------------------
def _gcn_layer_kernel(a_ref, x_ref, w_ref, b_ref, o_ref, acc_ref, *, apply_relu):
    k = pl.program_id(1)

    @pl.when(k == 0)
    def _():
        acc_ref[...] = jnp.zeros_like(acc_ref)

    # Fused feature transform for this k-tile (f32 accumulate, bf16 to MXU).
    xw = jnp.dot(x_ref[...], w_ref[...], preferred_element_type=jnp.float32)
    acc_ref[...] += jnp.dot(
        a_ref[...], xw.astype(jnp.bfloat16), preferred_element_type=jnp.float32
    )

    @pl.when(k == pl.num_programs(1) - 1)
    def _():
        h = acc_ref[...] + b_ref[...]          # bias (+ ReLU) in f32 (v5e-safe)
        if apply_relu:
            h = jnp.maximum(h, 0.0)
        o_ref[...] = h.astype(o_ref.dtype)


def gcn_fused_layer(a_hat, x, w, b, *, row_tile, k_tile, apply_relu):
    n = a_hat.shape[0]
    f = x.shape[1]
    h = w.shape[1]
    row_tiles = n // row_tile
    k_tiles = n // k_tile

    flops = 2 * n * n * h + row_tiles * 2 * n * f * h       # agg + recomputed XW
    bytes_accessed = (
        a_hat.size * a_hat.dtype.itemsize
        + x.size * x.dtype.itemsize * row_tiles              # X re-streamed/row tile
        + w.size * w.dtype.itemsize
        + b.size * b.dtype.itemsize
        + n * h * 2                                          # bf16 output
    )

    kernel = functools.partial(_gcn_layer_kernel, apply_relu=apply_relu)
    return pl.pallas_call(
        kernel,
        out_shape=jax.ShapeDtypeStruct((n, h), jnp.bfloat16),
        grid=(row_tiles, k_tiles),
        in_specs=[
            pl.BlockSpec((row_tile, k_tile), lambda i, k: (i, k)),   # A_hat
            pl.BlockSpec((k_tile, f), lambda i, k: (k, 0)),          # X (full f)
            pl.BlockSpec((f, h), lambda i, k: (0, 0)),               # W resident
            pl.BlockSpec((1, h), lambda i, k: (0, 0)),               # bias
        ],
        out_specs=pl.BlockSpec((row_tile, h), lambda i, k: (i, 0)),
        scratch_shapes=[pltpu.VMEM((row_tile, h), jnp.float32)],
        compiler_params=pltpu.CompilerParams(
            dimension_semantics=("parallel", "arbitrary"),
            vmem_limit_bytes=_VMEM_LIMIT,
        ),
        cost_estimate=pl.CostEstimate(
            flops=int(flops), transcendentals=0, bytes_accessed=int(bytes_accessed)
        ),
    )(a_hat, x, w, b)


# ---------------------------------------------------------------------------
# Kernel 2: fused second GCN layer + pooled head
#   H2      = A_hat @ (H1 @ W2) + b2          (no ReLU)
#   pooled  = P @ H2                           (accumulated across row tiles)
#   out     = ReLU(pooled) @ W3 + b3           (written on the last grid step)
# The pooled accumulator and the resident (g, o) output are carried across
# BOTH grid axes -> both axes "arbitrary" (no megacore race).
# ---------------------------------------------------------------------------
def _gcn_layer_pool_head_kernel(a_ref, x_ref, w_ref, b_ref, p_ref, w3_ref,
                                b3_ref, o_ref, acc_ref, pooled_ref):
    i = pl.program_id(0)
    k = pl.program_id(1)

    @pl.when(jnp.logical_and(i == 0, k == 0))
    def _():
        pooled_ref[...] = jnp.zeros_like(pooled_ref)

    @pl.when(k == 0)
    def _():
        acc_ref[...] = jnp.zeros_like(acc_ref)

    xw = jnp.dot(x_ref[...], w_ref[...], preferred_element_type=jnp.float32)
    acc_ref[...] += jnp.dot(
        a_ref[...], xw.astype(jnp.bfloat16), preferred_element_type=jnp.float32
    )

    last_k = k == pl.num_programs(1) - 1

    @pl.when(last_k)
    def _():
        h2 = acc_ref[...] + b_ref[...]                       # conv2 output (f32)
        # Accumulate mean-pool contribution of this row tile (f32, tiny matmul).
        pooled_ref[...] += jnp.dot(p_ref[...], h2, preferred_element_type=jnp.float32)

    @pl.when(jnp.logical_and(last_k, i == pl.num_programs(0) - 1))
    def _():
        pooled = jnp.maximum(pooled_ref[...], 0.0)           # ReLU after pooling
        out = jnp.dot(pooled, w3_ref[...], preferred_element_type=jnp.float32)
        o_ref[...] = (out + b3_ref[...]).astype(o_ref.dtype)


def gcn_layer_pool_head(a_hat, x, w, b, pool_mat, w3, b3, *, row_tile, k_tile):
    n = a_hat.shape[0]
    f = x.shape[1]
    h = w.shape[1]
    g = pool_mat.shape[0]
    o = w3.shape[1]
    row_tiles = n // row_tile
    k_tiles = n // k_tile

    flops = (2 * n * n * h + row_tiles * 2 * n * f * h
             + 2 * g * n * h + 2 * g * h * o)
    bytes_accessed = (
        a_hat.size * a_hat.dtype.itemsize
        + x.size * x.dtype.itemsize * row_tiles
        + w.size * w.dtype.itemsize
        + pool_mat.size * pool_mat.dtype.itemsize
        + w3.size * w3.dtype.itemsize
        + g * o * 4
    )

    return pl.pallas_call(
        _gcn_layer_pool_head_kernel,
        out_shape=jax.ShapeDtypeStruct((g, o), jnp.float32),
        grid=(row_tiles, k_tiles),
        in_specs=[
            pl.BlockSpec((row_tile, k_tile), lambda i, k: (i, k)),   # A_hat
            pl.BlockSpec((k_tile, f), lambda i, k: (k, 0)),          # H1
            pl.BlockSpec((f, h), lambda i, k: (0, 0)),               # W2 resident
            pl.BlockSpec((1, h), lambda i, k: (0, 0)),               # b2
            pl.BlockSpec((g, row_tile), lambda i, k: (0, i)),        # P columns of row tile
            pl.BlockSpec((h, o), lambda i, k: (0, 0)),               # W3 resident
            pl.BlockSpec((1, o), lambda i, k: (0, 0)),               # b3
        ],
        out_specs=pl.BlockSpec((g, o), lambda i, k: (0, 0)),
        scratch_shapes=[
            pltpu.VMEM((row_tile, h), jnp.float32),                  # H2 tile acc
            pltpu.VMEM((g, h), jnp.float32),                         # pooled acc
        ],
        compiler_params=pltpu.CompilerParams(
            # pooled accumulator + resident output span both grid axes.
            dimension_semantics=("arbitrary", "arbitrary"),
            vmem_limit_bytes=_VMEM_LIMIT,
        ),
        cost_estimate=pl.CostEstimate(
            flops=int(flops), transcendentals=0, bytes_accessed=int(bytes_accessed)
        ),
    )(a_hat, x, w, b, pool_mat, w3, b3)


# ---------------------------------------------------------------------------
# Full forward (padding + casts + 2 pallas_calls)
# ---------------------------------------------------------------------------
def simple_gcn_pallas(a_hat, x, w1, b1, w2, b2, pool_mat, w3, b3):
    n = x.shape[0]
    f = x.shape[1]
    g = pool_mat.shape[0]
    o = w3.shape[1]

    n_pad, row_tile, k_tile = _choose_tiles(n)
    h1_pad = _round_up(w1.shape[1], 128)
    h2_pad = _round_up(w2.shape[1], 128)
    o_pad = _round_up(o, 128)            # lane-dense head output
    g_pad = _round_up(g, 8)              # f32 sublane packing

    f32, bf16 = jnp.float32, jnp.bfloat16

    def pad2(arr, rows, cols, dtype):
        pr, pc = rows - arr.shape[0], cols - arr.shape[1]
        return jnp.pad(arr.astype(f32), ((0, pr), (0, pc))).astype(dtype)

    # NOTE: padded A_hat rows/cols and padded P columns are zero, so padded
    # node rows of H1 (which hold ReLU(b1), not zero) never contribute to any
    # real output; padded W/bias rows/cols are zero, so padded feature columns
    # are exact as well.
    a_p = pad2(a_hat, n_pad, n_pad, bf16)        # big stream -> bf16
    x_p = pad2(x, n_pad, f, bf16)                # feature dim left unpadded
    w1_p = pad2(w1, f, h1_pad, bf16)
    w2_p = pad2(w2, h1_pad, h2_pad, bf16)
    b1_p = pad2(b1, 1, h1_pad, f32)
    b2_p = pad2(b2, 1, h2_pad, f32)
    p_p = pad2(pool_mat, g_pad, n_pad, f32)      # tiny -> keep f32 for accuracy
    w3_p = pad2(w3, h2_pad, o_pad, f32)
    b3_p = pad2(b3, 1, o_pad, f32)

    # GCNConv 1 (fused X@W1): H1 = ReLU(A_hat @ (X @ W1) + b1)
    h1 = gcn_fused_layer(a_p, x_p, w1_p, b1_p,
                         row_tile=row_tile, k_tile=k_tile, apply_relu=True)
    # GCNConv 2 + global_mean_pool -> ReLU -> Linear, all in one kernel.
    out = gcn_layer_pool_head(a_p, h1, w2_p, b2_p, p_p, w3_p, b3_p,
                              row_tile=row_tile, k_tile=k_tile)
    return out[:g, :o]


# ----------------------------- plain-JAX glue -------------------------------
def build_gcn_adjacency(edge_index, num_nodes):
    """Dense A_hat = D^{-1/2}(A+I)D^{-1/2}, matching PyG GCNConv gcn_norm."""
    src, dst = edge_index[0], edge_index[1]
    loops = jnp.arange(num_nodes, dtype=edge_index.dtype)
    src = jnp.concatenate([src, loops])
    dst = jnp.concatenate([dst, loops])
    ew = jnp.ones(src.shape[0], dtype=jnp.float32)
    deg = jnp.zeros((num_nodes,), jnp.float32).at[dst].add(ew)
    dinv = jnp.where(deg > 0, 1.0 / jnp.sqrt(deg), 0.0)
    norm = dinv[dst] * ew * dinv[src]
    return jnp.zeros((num_nodes, num_nodes), jnp.float32).at[dst, src].add(norm)


def build_pool_matrix(batch, num_graphs, num_nodes):
    """P[g, n] = 1/|graph g| if batch[n] == g  (global_mean_pool)."""
    onehot = (batch[None, :] == jnp.arange(num_graphs)[:, None]).astype(jnp.float32)
    counts = jnp.maximum(onehot.sum(axis=1, keepdims=True), 1.0)
    return onehot / counts


def reference_forward(a_hat, x, w1, b1, w2, b2, pool_mat, w3, b3):
    h1 = jnp.maximum(a_hat @ (x @ w1) + b1, 0.0)
    h2 = a_hat @ (h1 @ w2) + b2
    pooled = jnp.maximum(pool_mat @ h2, 0.0)
    return pooled @ w3 + b3


# --------------------------------- main --------------------------------------
if __name__ == "__main__":
    key = jax.random.PRNGKey(0)

    num_graphs = 4
    nodes_per_graph = 128
    N = num_graphs * nodes_per_graph      # 512 nodes -> 2 row tiles x 1 k tile
    input_dim = 16
    hidden_dim1 = 64
    hidden_dim2 = 64
    output_dim = 8

    ks = jax.random.split(key, 8)

    # Node features.
    x = jax.random.normal(ks[0], (N, input_dim), dtype=jnp.float32)

    # Batched disjoint undirected ring graphs (block-diagonal A_hat).
    srcs, dsts = [], []
    for gidx in range(num_graphs):
        base = gidx * nodes_per_graph
        s = jnp.arange(nodes_per_graph, dtype=jnp.int32) + base
        d = (jnp.arange(nodes_per_graph, dtype=jnp.int32) + 1) % nodes_per_graph + base
        srcs += [s, d]
        dsts += [d, s]
    edge_index = jnp.stack([jnp.concatenate(srcs), jnp.concatenate(dsts)], axis=0)
    batch = jnp.repeat(jnp.arange(num_graphs, dtype=jnp.int32), nodes_per_graph)

    # Deterministic parameters (GCNConv / nn.Linear shapes).
    w1 = jax.random.normal(ks[1], (input_dim, hidden_dim1), jnp.float32) * 0.2
    b1 = jax.random.normal(ks[2], (1, hidden_dim1), jnp.float32) * 0.1
    w2 = jax.random.normal(ks[3], (hidden_dim1, hidden_dim2), jnp.float32) * 0.2
    b2 = jax.random.normal(ks[4], (1, hidden_dim2), jnp.float32) * 0.1
    w3_t = jax.random.normal(ks[5], (output_dim, hidden_dim2), jnp.float32) * 0.2
    w3 = w3_t.T                           # nn.Linear weight is [out, in]
    b3 = jax.random.normal(ks[6], (1, output_dim), jnp.float32) * 0.1

    a_hat = build_gcn_adjacency(edge_index, N)
    pool_mat = build_pool_matrix(batch, num_graphs, N)

    fwd = jax.jit(simple_gcn_pallas)
    out = fwd(a_hat, x, w1, b1, w2, b2, pool_mat, w3, b3)
    out = jax.block_until_ready(out)

    ref = reference_forward(a_hat, x, w1, b1, w2, b2, pool_mat, w3, b3)
    assert out.shape == (num_graphs, output_dim)
    # bf16 MXU streams (A_hat, X/H1, W1, W2) with f32 accumulation & f32
    # pooling/head -> loosened tolerance vs the f32 reference.
    assert jnp.allclose(out, ref, atol=5e-2, rtol=5e-2), float(
        jnp.max(jnp.abs(out - ref))
    )

    print("KERNEL_OK")
</pallas_src>

<mosaic_0001>
module attributes {stable_mosaic.version = 11 : i64} {
  func.func @_gcn_layer_kernel(%arg0: i32, %arg1: i32, %arg2: memref<256x512xbf16, #tpu.memory_space<vmem>>, %arg3: memref<512x16xbf16, #tpu.memory_space<vmem>>, %arg4: memref<16x128xbf16, #tpu.memory_space<vmem>>, %arg5: memref<1x128xf32, #tpu.memory_space<vmem>>, %arg6: memref<256x128xbf16, #tpu.memory_space<vmem>>, %arg7: memref<256x128xf32, #tpu.memory_space<vmem>>) attributes {dimension_semantics = [#tpu.dimension_semantics<parallel>, #tpu.dimension_semantics<arbitrary>], iteration_bounds = array<i64: 2, 1>, scalar_prefetch = 0 : i64, scratch_operands = 1 : i64, tpu.core_type = #tpu.core_type<tc>, window_params = [{transform_indices = @transform_0, window_bounds = array<i64: 256, 512>}, {transform_indices = @transform_1, window_bounds = array<i64: 512, 16>}, {pipeline_mode = #tpu.pipeline_mode<synchronous>, transform_indices = @transform_2, window_bounds = array<i64: 16, 128>}, {pipeline_mode = #tpu.pipeline_mode<synchronous>, transform_indices = @transform_3, window_bounds = array<i64: 1, 128>}, {transform_indices = @transform_4, window_bounds = array<i64: 256, 128>}]} {
    %c0_i32 = arith.constant 0 : i32
    %0 = arith.cmpi eq, %arg1, %c0_i32 : i32
    %1 = arith.extui %0 : i1 to i32
    %c0_i32_0 = arith.constant 0 : i32
    %2 = arith.cmpi ne, %1, %c0_i32_0 : i32
    scf.if %2 {
      %cst_13 = arith.constant 0.000000e+00 : f32
      %15 = vector.broadcast %cst_13 : f32 to vector<256x128xf32>
      %c0_14 = arith.constant 0 : index
      %c0_15 = arith.constant 0 : index
      %16 = vector.load %arg7[%c0_14, %c0_15] : memref<256x128xf32, #tpu.memory_space<vmem>>, vector<256x128xf32>
      tpu.vector_store %arg7[%c0_14, %c0_15], %15 {strides = array<i32>} : memref<256x128xf32, #tpu.memory_space<vmem>>, vector<256x128xf32>,
    } else {
    }
    %c0 = arith.constant 0 : index
    %c0_1 = arith.constant 0 : index
    %3 = vector.load %arg3[%c0, %c0_1] : memref<512x16xbf16, #tpu.memory_space<vmem>>, vector<512x16xbf16>
    %c0_2 = arith.constant 0 : index
    %c0_3 = arith.constant 0 : index
    %4 = vector.load %arg4[%c0_2, %c0_3] : memref<16x128xbf16, #tpu.memory_space<vmem>>, vector<16x128xbf16>
    %cst = arith.constant dense<0.000000e+00> : vector<512x128xf32>
    %5 = tpu.matmul %3, %4, %cst {dimension_numbers = #tpu.dot_dimension_numbers<[1], [0], [0], [1], [0, 0, 1, 1], [], []>} : vector<512x16xbf16>, vector<16x128xbf16>, vector<512x128xf32> -> vector<512x128xf32>
    %c0_4 = arith.constant 0 : index
    %c0_5 = arith.constant 0 : index
    %6 = vector.load %arg7[%c0_4, %c0_5] : memref<256x128xf32, #tpu.memory_space<vmem>>, vector<256x128xf32>
    %c0_6 = arith.constant 0 : index
    %c0_7 = arith.constant 0 : index
    %7 = vector.load %arg2[%c0_6, %c0_7] : memref<256x512xbf16, #tpu.memory_space<vmem>>, vector<256x512xbf16>
    %8 = arith.truncf %5 : vector<512x128xf32> to vector<512x128xbf16>
    %cst_8 = arith.constant dense<0.000000e+00> : vector<256x128xf32>
    %9 = tpu.matmul %7, %8, %cst_8 {dimension_numbers = #tpu.dot_dimension_numbers<[1], [0], [0], [1], [0, 0, 1, 1], [], []>} : vector<256x512xbf16>, vector<512x128xbf16>, vector<256x128xf32> -> vector<256x128xf32>
    %10 = arith.addf %6, %9 : vector<256x128xf32>
    %c0_9 = arith.constant 0 : index
    %c0_10 = arith.constant 0 : index
    %11 = vector.load %arg7[%c0_9, %c0_10] : memref<256x128xf32, #tpu.memory_space<vmem>>, vector<256x128xf32>
    tpu.vector_store %arg7[%c0_9, %c0_10], %10 {strides = array<i32>} : memref<256x128xf32, #tpu.memory_space<vmem>>, vector<256x128xf32>,
    %c0_i32_11 = arith.constant 0 : i32
    %12 = arith.cmpi eq, %arg1, %c0_i32_11 : i32
    %13 = arith.extui %12 : i1 to i32
    %c0_i32_12 = arith.constant 0 : i32
    %14 = arith.cmpi ne, %13, %c0_i32_12 : i32
    scf.if %14 {
      %c0_13 = arith.constant 0 : index
      %c0_14 = arith.constant 0 : index
      %15 = vector.load %arg7[%c0_13, %c0_14] : memref<256x128xf32, #tpu.memory_space<vmem>>, vector<256x128xf32>
      %c0_15 = arith.constant 0 : index
      %c0_16 = arith.constant 0 : index
      %16 = vector.load %arg5[%c0_15, %c0_16] : memref<1x128xf32, #tpu.memory_space<vmem>>, vector<1x128xf32>
      %17 = vector.broadcast %16 : vector<1x128xf32> to vector<256x128xf32>
      %18 = arith.addf %15, %17 : vector<256x128xf32>
      %cst_17 = arith.constant 0.000000e+00 : f32
      %19 = vector.broadcast %cst_17 : f32 to vector<256x128xf32>
      %20 = arith.maximumf %18, %19 : vector<256x128xf32>
      %21 = arith.truncf %20 : vector<256x128xf32> to vector<256x128xbf16>
      %c0_18 = arith.constant 0 : index
      %c0_19 = arith.constant 0 : index
      %22 = vector.load %arg6[%c0_18, %c0_19] : memref<256x128xbf16, #tpu.memory_space<vmem>>, vector<256x128xbf16>
      tpu.vector_store %arg6[%c0_18, %c0_19], %21 {strides = array<i32>} : memref<256x128xbf16, #tpu.memory_space<vmem>>, vector<256x128xbf16>,
    } else {
    }
    return
  }
  func.func @transform_0(%arg0: i32, %arg1: i32) -> (i32, i32) {
    %c0_i32 = arith.constant 0 : i32
    return %arg0, %arg1 : i32, i32
  }
  func.func @transform_1(%arg0: i32, %arg1: i32) -> (i32, i32) {
    %c0_i32 = arith.constant 0 : i32
    %c0_i32_0 = arith.constant 0 : i32
    return %arg1, %c0_i32 : i32, i32
  }
  func.func @transform_2(%arg0: i32, %arg1: i32) -> (i32, i32) {
    %c0_i32 = arith.constant 0 : i32
    %c0_i32_0 = arith.constant 0 : i32
    %c0_i32_1 = arith.constant 0 : i32
    return %c0_i32, %c0_i32_0 : i32, i32
  }
  func.func @transform_3(%arg0: i32, %arg1: i32) -> (i32, i32) {
    %c0_i32 = arith.constant 0 : i32
    %c0_i32_0 = arith.constant 0 : i32
    %c0_i32_1 = arith.constant 0 : i32
    return %c0_i32, %c0_i32_0 : i32, i32
  }
  func.func @transform_4(%arg0: i32, %arg1: i32) -> (i32, i32) {
    %c0_i32 = arith.constant 0 : i32
    %c0_i32_0 = arith.constant 0 : i32
    return %arg0, %c0_i32 : i32, i32
  }
}

module attributes {stable_mosaic.version = 11 : i64} {
  func.func @_gcn_layer_pool_head_kernel(%arg0: i32, %arg1: i32, %arg2: memref<256x512xbf16, #tpu.memory_space<vmem>>, %arg3: memref<512x128xbf16, #tpu.memory_space<vmem>>, %arg4: memref<128x128xbf16, #tpu.memory_space<vmem>>, %arg5: memref<1x128xf32, #tpu.memory_space<vmem>>, %arg6: memref<8x256xf32, #tpu.memory_space<vmem>>, %arg7: memref<128x128xf32, #tpu.memory_space<vmem>>, %arg8: memref<1x128xf32, #tpu.memory_space<vmem>>, %arg9: memref<8x128xf32, #tpu.memory_space<vmem>>, %arg10: memref<256x128xf32, #tpu.memory_space<vmem>>, %arg11: memref<8x128xf32, #tpu.memory_space<vmem>>) attributes {dimension_semantics = [#tpu.dimension_semantics<arbitrary>, #tpu.dimension_semantics<arbitrary>], iteration_bounds = array<i64: 2, 1>, scalar_prefetch = 0 : i64, scratch_operands = 2 : i64, tpu.core_type = #tpu.core_type<tc>, window_params = [{transform_indices = @transform_0, window_bounds = array<i64: 256, 512>}, {transform_indices = @transform_1, window_bounds = array<i64: 512, 128>}, {pipeline_mode = #tpu.pipeline_mode<synchronous>, transform_indices = @transform_2, window_bounds = array<i64: 128, 128>}, {pipeline_mode = #tpu.pipeline_mode<synchronous>, transform_indices = @transform_3, window_bounds = array<i64: 1, 128>}, {transform_indices = @transform_4, window_bounds = array<i64: 8, 256>}, {pipeline_mode = #tpu.pipeline_mode<synchronous>, transform_indices = @transform_5, window_bounds = array<i64: 128, 128>}, {pipeline_mode = #tpu.pipeline_mode<synchronous>, transform_indices = @transform_6, window_bounds = array<i64: 1, 128>}, {pipeline_mode = #tpu.pipeline_mode<synchronous>, transform_indices = @transform_7, window_bounds = array<i64: 8, 128>}]} {
    %c0_i32 = arith.constant 0 : i32
    %0 = arith.cmpi eq, %arg0, %c0_i32 : i32
    %c0_i32_0 = arith.constant 0 : i32
    %1 = arith.cmpi eq, %arg1, %c0_i32_0 : i32
    %2 = arith.andi %0, %1 : i1
    %3 = arith.extui %2 : i1 to i32
    %c0_i32_1 = arith.constant 0 : i32
    %4 = arith.cmpi ne, %3, %c0_i32_1 : i32
    scf.if %4 {
      %cst_17 = arith.constant 0.000000e+00 : f32
      %24 = vector.broadcast %cst_17 : f32 to vector<8x128xf32>
      %c0_18 = arith.constant 0 : index
      %c0_19 = arith.constant 0 : index
      %25 = vector.load %arg11[%c0_18, %c0_19] : memref<8x128xf32, #tpu.memory_space<vmem>>, vector<8x128xf32>
      tpu.vector_store %arg11[%c0_18, %c0_19], %24 {strides = array<i32>} : memref<8x128xf32, #tpu.memory_space<vmem>>, vector<8x128xf32>,
    } else {
    }
    %c0_i32_2 = arith.constant 0 : i32
    %5 = arith.cmpi eq, %arg1, %c0_i32_2 : i32
    %6 = arith.extui %5 : i1 to i32
    %c0_i32_3 = arith.constant 0 : i32
    %7 = arith.cmpi ne, %6, %c0_i32_3 : i32
    scf.if %7 {
      %cst_17 = arith.constant 0.000000e+00 : f32
      %24 = vector.broadcast %cst_17 : f32 to vector<256x128xf32>
      %c0_18 = arith.constant 0 : index
      %c0_19 = arith.constant 0 : index
      %25 = vector.load %arg10[%c0_18, %c0_19] : memref<256x128xf32, #tpu.memory_space<vmem>>, vector<256x128xf32>
      tpu.vector_store %arg10[%c0_18, %c0_19], %24 {strides = array<i32>} : memref<256x128xf32, #tpu.memory_space<vmem>>, vector<256x128xf32>,
    } else {
    }
    %c0 = arith.constant 0 : index
    %c0_4 = arith.constant 0 : index
    %8 = vector.load %arg3[%c0, %c0_4] : memref<512x128xbf16, #tpu.memory_space<vmem>>, vector<512x128xbf16>
    %c0_5 = arith.constant 0 : index
    %c0_6 = arith.constant 0 : index
    %9 = vector.load %arg4[%c0_5, %c0_6] : memref<128x128xbf16, #tpu.memory_space<vmem>>, vector<128x128xbf16>
    %cst = arith.constant dense<0.000000e+00> : vector<512x128xf32>
    %10 = tpu.matmul %8, %9, %cst {dimension_numbers = #tpu.dot_dimension_numbers<[1], [0], [0], [1], [0, 0, 1, 1], [], []>} : vector<512x128xbf16>, vector<128x128xbf16>, vector<512x128xf32> -> vector<512x128xf32>
    %c0_7 = arith.constant 0 : index
    %c0_8 = arith.constant 0 : index
    %11 = vector.load %arg10[%c0_7, %c0_8] : memref<256x128xf32, #tpu.memory_space<vmem>>, vector<256x128xf32>
    %c0_9 = arith.constant 0 : index
    %c0_10 = arith.constant 0 : index
    %12 = vector.load %arg2[%c0_9, %c0_10] : memref<256x512xbf16, #tpu.memory_space<vmem>>, vector<256x512xbf16>
    %13 = arith.truncf %10 : vector<512x128xf32> to vector<512x128xbf16>
    %cst_11 = arith.constant dense<0.000000e+00> : vector<256x128xf32>
    %14 = tpu.matmul %12, %13, %cst_11 {dimension_numbers = #tpu.dot_dimension_numbers<[1], [0], [0], [1], [0, 0, 1, 1], [], []>} : vector<256x512xbf16>, vector<512x128xbf16>, vector<256x128xf32> -> vector<256x128xf32>
    %15 = arith.addf %11, %14 : vector<256x128xf32>
    %c0_12 = arith.constant 0 : index
    %c0_13 = arith.constant 0 : index
    %16 = vector.load %arg10[%c0_12, %c0_13] : memref<256x128xf32, #tpu.memory_space<vmem>>, vector<256x128xf32>
    tpu.vector_store %arg10[%c0_12, %c0_13], %15 {strides = array<i32>} : memref<256x128xf32, #tpu.memory_space<vmem>>, vector<256x128xf32>,
    %c0_i32_14 = arith.constant 0 : i32
    %17 = arith.cmpi eq, %arg1, %c0_i32_14 : i32
    %18 = arith.extui %17 : i1 to i32
    %c0_i32_15 = arith.constant 0 : i32
    %19 = arith.cmpi ne, %18, %c0_i32_15 : i32
    scf.if %19 {
      %c0_17 = arith.constant 0 : index
      %c0_18 = arith.constant 0 : index
      %24 = vector.load %arg10[%c0_17, %c0_18] : memref<256x128xf32, #tpu.memory_space<vmem>>, vector<256x128xf32>
      %c0_19 = arith.constant 0 : index
      %c0_20 = arith.constant 0 : index
      %25 = vector.load %arg5[%c0_19, %c0_20] : memref<1x128xf32, #tpu.memory_space<vmem>>, vector<1x128xf32>
      %26 = vector.broadcast %25 : vector<1x128xf32> to vector<256x128xf32>
      %27 = arith.addf %24, %26 : vector<256x128xf32>
      %c0_21 = arith.constant 0 : index
      %c0_22 = arith.constant 0 : index
      %28 = vector.load %arg11[%c0_21, %c0_22] : memref<8x128xf32, #tpu.memory_space<vmem>>, vector<8x128xf32>
      %c0_23 = arith.constant 0 : index
      %c0_24 = arith.constant 0 : index
      %29 = vector.load %arg6[%c0_23, %c0_24] : memref<8x256xf32, #tpu.memory_space<vmem>>, vector<8x256xf32>
      %cst_25 = arith.constant dense<0.000000e+00> : vector<8x128xf32>
      %30 = tpu.matmul %29, %27, %cst_25 {dimension_numbers = #tpu.dot_dimension_numbers<[1], [0], [0], [1], [0, 0, 1, 1], [], []>} : vector<8x256xf32>, vector<256x128xf32>, vector<8x128xf32> -> vector<8x128xf32>
      %31 = arith.addf %28, %30 : vector<8x128xf32>
      %c0_26 = arith.constant 0 : index
      %c0_27 = arith.constant 0 : index
      %32 = vector.load %arg11[%c0_26, %c0_27] : memref<8x128xf32, #tpu.memory_space<vmem>>, vector<8x128xf32>
      tpu.vector_store %arg11[%c0_26, %c0_27], %31 {strides = array<i32>} : memref<8x128xf32, #tpu.memory_space<vmem>>, vector<8x128xf32>,
    } else {
    }
    %c1_i32 = arith.constant 1 : i32
    %20 = arith.cmpi eq, %arg0, %c1_i32 : i32
    %21 = arith.andi %17, %20 : i1
    %22 = arith.extui %21 : i1 to i32
    %c0_i32_16 = arith.constant 0 : i32
    %23 = arith.cmpi ne, %22, %c0_i32_16 : i32
    scf.if %23 {
      %c0_17 = arith.constant 0 : index
      %c0_18 = arith.constant 0 : index
      %24 = vector.load %arg11[%c0_17, %c0_18] : memref<8x128xf32, #tpu.memory_space<vmem>>, vector<8x128xf32>
      %cst_19 = arith.constant 0.000000e+00 : f32
      %25 = vector.broadcast %cst_19 : f32 to vector<8x128xf32>
      %26 = arith.maximumf %24, %25 : vector<8x128xf32>
      %c0_20 = arith.constant 0 : index
      %c0_21 = arith.constant 0 : index
      %27 = vector.load %arg7[%c0_20, %c0_21] : memref<128x128xf32, #tpu.memory_space<vmem>>, vector<128x128xf32>
      %cst_22 = arith.constant dense<0.000000e+00> : vector<8x128xf32>
      %28 = tpu.matmul %26, %27, %cst_22 {dimension_numbers = #tpu.dot_dimension_numbers<[1], [0], [0], [1], [0, 0, 1, 1], [], []>} : vector<8x128xf32>, vector<128x128xf32>, vector<8x128xf32> -> vector<8x128xf32>
      %c0_23 = arith.constant 0 : index
      %c0_24 = arith.constant 0 : index
      %29 = vector.load %arg8[%c0_23, %c0_24] : memref<1x128xf32, #tpu.memory_space<vmem>>, vector<1x128xf32>
      %30 = vector.broadcast %29 : vector<1x128xf32> to vector<8x128xf32>
      %31 = arith.addf %28, %30 : vector<8x128xf32>
      %c0_25 = arith.constant 0 : index
      %c0_26 = arith.constant 0 : index
      %32 = vector.load %arg9[%c0_25, %c0_26] : memref<8x128xf32, #tpu.memory_space<vmem>>, vector<8x128xf32>
      tpu.vector_store %arg9[%c0_25, %c0_26], %31 {strides = array<i32>} : memref<8x128xf32, #tpu.memory_space<vmem>>, vector<8x128xf32>,
    } else {
    }
    return
  }
  func.func @transform_0(%arg0: i32, %arg1: i32) -> (i32, i32) {
    %c0_i32 = arith.constant 0 : i32
    return %arg0, %arg1 : i32, i32
  }
  func.func @transform_1(%arg0: i32, %arg1: i32) -> (i32, i32) {
    %c0_i32 = arith.constant 0 : i32
    %c0_i32_0 = arith.constant 0 : i32
    return %arg1, %c0_i32 : i32, i32
  }
  func.func @transform_2(%arg0: i32, %arg1: i32) -> (i32, i32) {
    %c0_i32 = arith.constant 0 : i32
    %c0_i32_0 = arith.constant 0 : i32
    %c0_i32_1 = arith.constant 0 : i32
    return %c0_i32, %c0_i32_0 : i32, i32
  }
  func.func @transform_3(%arg0: i32, %arg1: i32) -> (i32, i32) {
    %c0_i32 = arith.constant 0 : i32
    %c0_i32_0 = arith.constant 0 : i32
    %c0_i32_1 = arith.constant 0 : i32
    return %c0_i32, %c0_i32_0 : i32, i32
  }
  func.func @transform_4(%arg0: i32, %arg1: i32) -> (i32, i32) {
    %c0_i32 = arith.constant 0 : i32
    %c0_i32_0 = arith.constant 0 : i32
    return %c0_i32, %arg0 : i32, i32
  }
  func.func @transform_5(%arg0: i32, %arg1: i32) -> (i32, i32) {
    %c0_i32 = arith.constant 0 : i32
    %c0_i32_0 = arith.constant 0 : i32
    %c0_i32_1 = arith.constant 0 : i32
    return %c0_i32, %c0_i32_0 : i32, i32
  }
  func.func @transform_6(%arg0: i32, %arg1: i32) -> (i32, i32) {
    %c0_i32 = arith.constant 0 : i32
    %c0_i32_0 = arith.constant 0 : i32
    %c0_i32_1 = arith.constant 0 : i32
    return %c0_i32, %c0_i32_0 : i32, i32
  }
  func.func @transform_7(%arg0: i32, %arg1: i32) -> (i32, i32) {
    %c0_i32 = arith.constant 0 : i32
    %c0_i32_0 = arith.constant 0 : i32
    %c0_i32_1 = arith.constant 0 : i32
    return %c0_i32, %c0_i32_0 : i32, i32
  }
}

</mosaic_0001>

<bundles_post_ra>
// kernel: simple_gcn_pallas.2
= control target key start
LH: loop header
LB: loop body
LE: loop exit
PB: predicated region body
PF: predicated region fallthrough
CT: control target
= control target key end

     0   :  { %s2925_s15 = smov 0   ;;  %s2927_s16 = smov 0   ;;  %s3331_s0 = inlined_call_operand.vmem [shape: bf16[512,512], index: 0, kind: input, shape index: {}]   ;;  %s3332_s1 = inlined_call_operand.vmem [shape: bf16[512,16], index: 1, kind: input, shape index: {}]   ;;  %s3333_s2 = inlined_call_operand.vmem [shape: bf16[16,128], index: 2, kind: input, shape index: {}]   ;;  %s3334_s3 = inlined_call_operand.vmem [shape: f32[1,128], index: 3, kind: input, shape index: {}]   ;;  %s3335_s4 = inlined_call_operand.vmem [shape: bf16[512,128], index: 4, kind: output, shape index: {}]  }
   0x1   :  { %s2929_s17 = smov 0  }
   0x2 LB: > { %s26_s18 = sadd.s32 1, %s2894_s16  ;;  %p2100_p0 = scmp.ge.s32.totalorder %s2898_s17, 1  ;;  %s2898_s17 = sphi %s2929_s17, %s14_s17   ;;  %s2894_s16 = sphi %s2927_s16, %s3337_s16   ;;  %s2890_s15 = sphi %s2925_s15, %s3336_s15  }
   0x3   : > { %p28_p1 = scmp.ge.s32.totalorder %s26_s18, 2  ;;  %p194_p2 = scmp.lt.s32.totalorder %s2898_s17, 3 }
   0x5   : > { %s3339_s18 = smov (%p28_p1, %s26_s18), 0  ;;  %p195_p3 = pnand %p2100_p0, %p194_p2 }
   0x6   : > { %v2747_v0 = vld [vmem:[%s3333_s2] sm:$0xff] (!%p195_p3)   ;;  %vm523_vm0 = vcmask (!%p195_p3), 130048   ;;  %v2750_v3 = vld [vmem:[%s3332_s1 + $0x8] sm:$0xff] (!%p195_p3)   ;;  %v2752_v5 = vld [vmem:[%s3332_s1 + $0x10] sm:$0xff] (!%p195_p3)   ;;  %s2101_s19 = sshll.u32 (!%p195_p3), %s2890_s15, 5 }
   0x7   : > { %198 = sbr.rel (%p195_p3) target bundleno = 638 (0x27e), region = 36  ;;  %v2748_v1 = vld [vmem:[%s3332_s1] sm:$0xff] (!%p195_p3)   ;;  %2655 = vmatprep.subr.bf16.mxu0 (!%p195_p3), %v2747_v0  ;;  %2721 = vmatprep.subr.bf16.mxu1 (!%p195_p3), %v2747_v0  ;;  %v2751_v4 = vld [vmem:[%s3332_s1 + $0x88] sm:$0xff] (!%p195_p3)   ;;  %v2753_v6 = vld [vmem:[%s3332_s1 + $0x90] sm:$0xff] (!%p195_p3)   ;;  %p232_p4 = scmp.lt.s32.totalorder (!%p195_p3), %s2101_s19, 63 }
   0x8   : > { %v2749_v2 = vld [vmem:[%s3332_s1 + $0x80] sm:$0xff] (!%p195_p3)   ;;  %2656 = vmatpush3.bf16.msra.mxu0 (!%p195_p3), %v2747_v0  ;;  %2722 = vmatpush3.bf16.msra.mxu1 (!%p195_p3), %v2747_v0  ;;  %v2754_v7 = vld [vmem:[%s3332_s1 + $0x18] sm:$0xff] (!%p195_p3)   ;;  %v2758_v11 = vld [vmem:[%s3332_s1 + $0x28] sm:$0xff] (!%p195_p3)  }
   0x9   : > { %2657 = vmatprep.mubr.msk.bf16.mxu0 (!%p195_p3), %vm523_vm0, %v2748_v1  ;;  %2689 = vmatprep.mubr.msk.bf16.mxu1 (!%p195_p3), %vm523_vm0, %v2749_v2  ;;  %v2755_v8 = vld [vmem:[%s3332_s1 + $0x98] sm:$0xff] (!%p195_p3)   ;;  %v2756_v9 = vld [vmem:[%s3332_s1 + $0x20] sm:$0xff] (!%p195_p3)   ;;  %v2759_v12 = vld [vmem:[%s3332_s1 + $0xa8] sm:$0xff] (!%p195_p3)  }
   0xa   : > { %v2757_v10 = vld [vmem:[%s3332_s1 + $0xa0] sm:$0xff] (!%p195_p3)   ;;  %v2760_v13 = vld [vmem:[%s3332_s1 + $0x30] sm:$0xff] (!%p195_p3)   ;;  %v2762_v15 = vld [vmem:[%s3332_s1 + $0x38] sm:$0xff] (!%p195_p3)  }
   0xb   : > { %2658 = vmatmul.mubr.msk.bf16.vlgmr.msra.gmra.mrb[0].mxu0 (!%p195_p3), %vm523_vm0, %v2750_v3  ;;  %2690 = vmatmul.mubr.msk.bf16.vlgmr.msra.gmra.mrb[0].mxu1 (!%p195_p3), %vm523_vm0, %v2751_v4  ;;  %v2761_v14 = vld [vmem:[%s3332_s1 + $0xb0] sm:$0xff] (!%p195_p3)   ;;  %v2763_v16 = vld [vmem:[%s3332_s1 + $0xb8] sm:$0xff] (!%p195_p3)   ;;  %v2764_v17 = vld [vmem:[%s3332_s1 + $0x40] sm:$0xff] (!%p195_p3)  }
   0xc   : > { %2661 = vmatprep.mubr.msk.bf16.mxu0 (!%p195_p3), %vm523_vm0, %v2752_v5  ;;  %2693 = vmatprep.mubr.msk.bf16.mxu1 (!%p195_p3), %vm523_vm0, %v2753_v6  ;;  %v2765_v18 = vld [vmem:[%s3332_s1 + $0xc0] sm:$0xff] (!%p195_p3)   ;;  %v2766_v19 = vld [vmem:[%s3332_s1 + $0x48] sm:$0xff] (!%p195_p3)   ;;  %v2768_v21 = vld [vmem:[%s3332_s1 + $0x50] sm:$0xff] (!%p195_p3)  }
   0xd   : > { %v2767_v20 = vld [vmem:[%s3332_s1 + $0xc8] sm:$0xff] (!%p195_p3)   ;;  %v2769_v22 = vld [vmem:[%s3332_s1 + $0xd0] sm:$0xff] (!%p195_p3)   ;;  %v2770_v23 = vld [vmem:[%s3332_s1 + $0x58] sm:$0xff] (!%p195_p3)  }
   0xe   : > { %v2771_v24 = vld [vmem:[%s3332_s1 + $0xd8] sm:$0xff]   ;;  %v2772_v25 = vld [vmem:[%s3332_s1 + $0x60] sm:$0xff]   ;;  %v2774_v27 = vld [vmem:[%s3332_s1 + $0x68] sm:$0xff]   ;;  %s3341_s19 = smov (!%p232_p4, %s2101_s19), 63 }
   0xf   : > { %v2773_v26 = vld [vmem:[%s3332_s1 + $0xe0] sm:$0xff]   ;;  %v2775_v28 = vld [vmem:[%s3332_s1 + $0xe8] sm:$0xff]   ;;  %v2776_v29 = vld [vmem:[%s3332_s1 + $0x70] sm:$0xff]   ;;  %s2270_s20 = sshll.u32 %s3341_s19, 4  ;;  %s2105_s25 = sshll.u32 %s3341_s19, 2 }
  0x10   : > { %v2777_v30 = vld [vmem:[%s3332_s1 + $0xf0] sm:$0xff]   ;;  %v2778_v31 = vld [vmem:[%s3332_s1 + $0x78] sm:$0xff]   ;;  %s3083_s23 = scalar_lea.vmem %s3331_s0, %s2270_s20  ;;  %s3274_s28 = scalar_lea.vmem %s3335_s4, %s2105_s25 }
  0x11   : > { %v2779_v32 = vld [vmem:[%s3332_s1 + $0xf8] sm:$0xff]   ;;  %v2782_v33 = vld [vmem:[%s3083_s23 + $0x4] ss:$16 sps:$4 sm:$0xff]  }
  0x12   : > { %v2785_v34 = vld [vmem:[%s3083_s23 + $0xc] ss:$16 sps:$4 sm:$0xff]  }
  0x13   : > { %2662 = vmatmul.mubr.msk.bf16.gmra.mrb[4].mxu0 %vm523_vm0, %v2754_v7  ;;  %2694 = vmatmul.mubr.msk.bf16.gmra.mrb[4].mxu1 %vm523_vm0, %v2755_v8 }
  0x14   : > { %2665 = vmatprep.mubr.msk.bf16.mxu0 %vm523_vm0, %v2756_v9  ;;  %2697 = vmatprep.mubr.msk.bf16.mxu1 %vm523_vm0, %v2757_v10 }
  0x1b   : > { %2666 = vmatmul.mubr.msk.bf16.gmra.mrb[8].mxu0 %vm523_vm0, %v2758_v11  ;;  %2698 = vmatmul.mubr.msk.bf16.gmra.mrb[8].mxu1 %vm523_vm0, %v2759_v12 }
  0x1c   : > { %2669 = vmatprep.mubr.msk.bf16.mxu0 %vm523_vm0, %v2760_v13  ;;  %2701 = vmatprep.mubr.msk.bf16.mxu1 %vm523_vm0, %v2761_v14 }
  0x23   : > { %2670 = vmatmul.mubr.msk.bf16.gmra.mrb[12].mxu0 %vm523_vm0, %v2762_v15  ;;  %2702 = vmatmul.mubr.msk.bf16.gmra.mrb[12].mxu1 %vm523_vm0, %v2763_v16 }
  0x24   : > { %2673 = vmatprep.mubr.msk.bf16.mxu0 %vm523_vm0, %v2764_v17  ;;  %2705 = vmatprep.mubr.msk.bf16.mxu1 %vm523_vm0, %v2765_v18 }
  0x2b   : > { %2674 = vmatmul.mubr.msk.bf16.gmra.mrb[16].mxu0 %vm523_vm0, %v2766_v19  ;;  %2706 = vmatmul.mubr.msk.bf16.gmra.mrb[16].mxu1 %vm523_vm0, %v2767_v20 }
  0x2c   : > { %2677 = vmatprep.mubr.msk.bf16.mxu0 %vm523_vm0, %v2768_v21  ;;  %2709 = vmatprep.mubr.msk.bf16.mxu1 %vm523_vm0, %v2769_v22 }
  0x33   : > { %2678 = vmatmul.mubr.msk.bf16.gmra.mrb[20].mxu0 %vm523_vm0, %v2770_v23  ;;  %2710 = vmatmul.mubr.msk.bf16.gmra.mrb[20].mxu1 %vm523_vm0, %v2771_v24 }
  0x34   : > { %2681 = vmatprep.mubr.msk.bf16.mxu0 %vm523_vm0, %v2772_v25  ;;  %2713 = vmatprep.mubr.msk.bf16.mxu1 %vm523_vm0, %v2773_v26 }
  0x3b   : > { %2682 = vmatmul.mubr.msk.bf16.gmra.mrb[24].mxu0 %vm523_vm0, %v2774_v27  ;;  %2714 = vmatmul.mubr.msk.bf16.gmra.mrb[24].mxu1 %vm523_vm0, %v2775_v28 }
  0x3c   : > { %2685 = vmatprep.mubr.msk.bf16.mxu0 %vm523_vm0, %v2776_v29  ;;  %2717 = vmatprep.mubr.msk.bf16.mxu1 %vm523_vm0, %v2777_v30 }
  0x43   : > { %2686 = vmatmul.mubr.msk.bf16.gmra.mrb[28].mxu0 %vm523_vm0, %v2778_v31  ;;  %2718 = vmatmul.mubr.msk.bf16.gmra.mrb[28].mxu1 %vm523_vm0, %v2779_v32 }
  0x44   : > { %1389 = vmatprep.mubr.bf16.mxu1 %v2782_v33  ;;  %1550 = vmatprep.mubr.bf16.mxu0 %v2785_v34 }
  0xde   : > { %v3087_v35 = vpop.f32.mrb[0].mxu0  ;;  %v3089_v36 = vpop.f32.mrb[0].mxu1 }
  0xdf   : > { %v654_v37 = vpop.f32.mrb[1].mxu0  ;;  %v782_v38 = vpop.f32.mrb[1].mxu1 }
  0xe0   : > { %v3091_v39 = vpop.f32.mrb[2].mxu0  ;;  %v3093_v40 = vpop.f32.mrb[2].mxu1 }
  0xe1   : > { %v1006_v41 = vpack.c.bf16 %v3091_v39, %v3087_v35  ;;  %v1022_v42 = vpack.c.bf16 %v3093_v40, %v3089_v36  ;;  %v657_v43 = vpop.f32.mrb[3].mxu0  ;;  %v785_v44 = vpop.f32.mrb[3].mxu1 }
  0xe2   : > { %v1005_v45 = vpack.c.bf16 %v657_v43, %v654_v37  ;;  %v1021_v46 = vpack.c.bf16 %v785_v44, %v782_v38 }
  0xe6   : > { %v3099_v47 = vpop.f32.mrb[4].mxu0  ;;  %v3101_v48 = vpop.f32.mrb[4].mxu1 }
  0xe7   : > { %v3103_v49 = vpop.f32.mrb[5].mxu0  ;;  %v3105_v50 = vpop.f32.mrb[5].mxu1 }
  0xe8   : > { %v3107_v51 = vpop.f32.mrb[6].mxu0  ;;  %v3109_v52 = vpop.f32.mrb[6].mxu1 }
  0xe9   : > { %v1008_v53 = vpack.c.bf16 %v3107_v51, %v3099_v47  ;;  %v1024_v54 = vpack.c.bf16 %v3109_v52, %v3101_v48  ;;  %v673_v55 = vpop.f32.mrb[7].mxu0  ;;  %v801_v56 = vpop.f32.mrb[7].mxu1 }
  0xea   : > { %v1007_v57 = vpack.c.bf16 %v673_v55, %v3103_v49  ;;  %v1023_v58 = vpack.c.bf16 %v801_v56, %v3105_v50 }
  0xee   : > { %v3117_v59 = vpop.f32.mrb[8].mxu0  ;;  %v3119_v60 = vpop.f32.mrb[8].mxu1 }
  0xef   : > { %v3121_v61 = vpop.f32.mrb[9].mxu0  ;;  %v3123_v62 = vpop.f32.mrb[9].mxu1 }
  0xf0   : > { %v3125_v63 = vpop.f32.mrb[10].mxu0  ;;  %v3127_v0 = vpop.f32.mrb[10].mxu1 }
  0xf1   : > { %v1010_v1 = vpack.c.bf16 %v3125_v63, %v3117_v59  ;;  %v1026_v2 = vpack.c.bf16 %v3127_v0, %v3119_v60  ;;  %v3133_v3 = vpop.f32.mrb[11].mxu0  ;;  %v3135_v4 = vpop.f32.mrb[11].mxu1  ;;  %v2780_v59 = vld [vmem:[%s3083_s23] ss:$16 sps:$4 sm:$0xff]   ;;  %v2783_v60 = vld [vmem:[%s3083_s23 + $0x8] ss:$16 sps:$4 sm:$0xff]  }
  0xf2   : > { %v1009_v5 = vpack.c.bf16 %v3133_v3, %v3121_v61  ;;  %v1025_v6 = vpack.c.bf16 %v3135_v4, %v3123_v62  ;;  %v2786_v63 = vld [vmem:[%s3083_s23 + $0x24] ss:$16 sps:$4 sm:$0xff]   ;;  %v2788_v0 = vld [vmem:[%s3083_s23 + $0x2c] ss:$16 sps:$4 sm:$0xff]  }
  0xf3   : > { %v2792_v4 = vld [vmem:[%s3083_s23 + $0x44] ss:$16 sps:$4 sm:$0xff]  }
  0xf6   : > { %v3141_v7 = vpop.f32.mrb[12].mxu0  ;;  %v3143_v8 = vpop.f32.mrb[12].mxu1 }
  0xf7   : > { %v3145_v9 = vpop.f32.mrb[13].mxu0  ;;  %v3147_v10 = vpop.f32.mrb[13].mxu1 }
  0xf8   : > { %v3149_v11 = vpop.f32.mrb[14].mxu0  ;;  %v3151_v12 = vpop.f32.mrb[14].mxu1 }
  0xf9   : > { %v1012_v13 = vpack.c.bf16 %v3149_v11, %v3141_v7  ;;  %v1028_v14 = vpack.c.bf16 %v3151_v12, %v3143_v8  ;;  %v3157_v15 = vpop.f32.mrb[15].mxu0  ;;  %v3159_v16 = vpop.f32.mrb[15].mxu1  ;;  %v2797_v7 = vld [vmem:[%s3083_s23 + $0x48] ss:$16 sps:$4 sm:$0xff]   ;;  %v2798_v8 = vld [vmem:[%s3083_s23 + $0x64] ss:$16 sps:$4 sm:$0xff]  }
  0xfa   : > { %v1011_v17 = vpack.c.bf16 %v3157_v15, %v3145_v9  ;;  %v1027_v18 = vpack.c.bf16 %v3159_v16, %v3147_v10  ;;  %v2800_v9 = vld [vmem:[%s3083_s23 + $0x6c] ss:$16 sps:$4 sm:$0xff]   ;;  %v2802_v10 = vld [vmem:[%s3083_s23 + $0x60] ss:$16 sps:$4 sm:$0xff]   ;;  %v2803_v11 = vld [vmem:[%s3083_s23 + $0x68] ss:$16 sps:$4 sm:$0xff]  }
  0xfb   : > { %v2804_v12 = vld [vmem:[%s3083_s23 + $0x84] ss:$16 sps:$4 sm:$0xff]   ;;  %v2809_v15 = vld [vmem:[%s3083_s23 + $0x88] ss:$16 sps:$4 sm:$0xff]  }
  0xfc   : > { %v2810_v16 = vld [vmem:[%s3083_s23 + $0xa4] ss:$16 sps:$4 sm:$0xff]  }
  0xfe   : > { %v2675_v19 = vpop.f32.mrb[16].mxu0  ;;  %v2707_v20 = vpop.f32.mrb[16].mxu1 }
  0xff   : > { %v718_v21 = vpop.f32.mrb[17].mxu0  ;;  %v846_v22 = vpop.f32.mrb[17].mxu1 }
 0x100   : > { %v2676_v23 = vpop.f32.mrb[18].mxu0  ;;  %v2708_v24 = vpop.f32.mrb[18].mxu1 }
 0x101   : > { %v1014_v25 = vpack.c.bf16 %v2676_v23, %v2675_v19  ;;  %v1030_v26 = vpack.c.bf16 %v2708_v24, %v2707_v20  ;;  %v721_v27 = vpop.f32.mrb[19].mxu0  ;;  %v849_v28 = vpop.f32.mrb[19].mxu1  ;;  %v2815_v24 = vld [vmem:[%s3083_s23 + $0xa8] ss:$16 sps:$4 sm:$0xff]  }
 0x102   : > { %v1013_v29 = vpack.c.bf16 %v721_v27, %v718_v21  ;;  %v1029_v30 = vpack.c.bf16 %v849_v28, %v846_v22  ;;  %v2820_v27 = vld [vmem:[%s3083_s23 + $0xc0] ss:$16 sps:$4 sm:$0xff]   ;;  %v2821_v28 = vld [vmem:[%s3083_s23 + $0xc8] ss:$16 sps:$4 sm:$0xff]  }
 0x104   : > { %2431 = vmatprep.subr.bf16.mxu1 %v1013_v29  ;;  %2543 = vmatprep.subr.bf16.mxu0 %v1029_v30  ;;  %v2822_v29 = vld [vmem:[%s3083_s23 + $0xe4] ss:$16 sps:$4 sm:$0xff]   ;;  %v2824_v30 = vld [vmem:[%s3083_s23 + $0xec] ss:$16 sps:$4 sm:$0xff]  }
 0x105   : > { %2432 = vmatpush3.bf16.msra.mxu1 %v1005_v45  ;;  %2544 = vmatpush3.bf16.msra.mxu0 %v1021_v46 }
 0x106   : > { %v2679_v31 = vpop.f32.mrb[20].mxu0  ;;  %v2711_v32 = vpop.f32.mrb[20].mxu1  ;;  %2433 = vmatprep.subr.bf16.mxu1 %v1014_v25  ;;  %2545 = vmatprep.subr.bf16.mxu0 %v1030_v26  ;;  %v2816_v25 = vld [vmem:[%s3083_s23 + $0xc4] ss:$16 sps:$4 sm:$0xff]   ;;  %v2818_v26 = vld [vmem:[%s3083_s23 + $0xcc] ss:$16 sps:$4 sm:$0xff]  }
 0x107   : > { %v734_v33 = vpop.f32.mrb[21].mxu0  ;;  %v862_v34 = vpop.f32.mrb[21].mxu1 }
 0x108   : > { %v2680_v37 = vpop.f32.mrb[22].mxu0  ;;  %v2712_v38 = vpop.f32.mrb[22].mxu1 }
 0x109   : > { %v1016_v43 = vpack.c.bf16 %v2680_v37, %v2679_v31  ;;  %v1032_v44 = vpack.c.bf16 %v2712_v38, %v2711_v32  ;;  %v737_v49 = vpop.f32.mrb[23].mxu0  ;;  %v865_v50 = vpop.f32.mrb[23].mxu1  ;;  %2434 = vmatpush3.bf16.msra.mxu1 %v1006_v41  ;;  %2546 = vmatpush3.bf16.msra.mxu0 %v1022_v42  ;;  %v2826_v31 = vld [vmem:[%s3083_s23 + $0xe0] ss:$16 sps:$4 sm:$0xff]   ;;  %v2827_v32 = vld [vmem:[%s3083_s23 + $0xe8] ss:$16 sps:$4 sm:$0xff]  }
 0x10a   : > { %v1015_v45 = vpack.c.bf16 %v737_v49, %v734_v33  ;;  %v1031_v46 = vpack.c.bf16 %v865_v50, %v862_v34  ;;  %v2828_v33 = vld [vmem:[%s3083_s23 + $0x104] ss:$16 sps:$4 sm:$0xff]   ;;  %v2830_v34 = vld [vmem:[%s3083_s23 + $0x10c] ss:$16 sps:$4 sm:$0xff]   ;;  %v2832_v37 = vld [vmem:[%s3083_s23 + $0x100] ss:$16 sps:$4 sm:$0xff]  }
 0x10b   : > { %v2833_v38 = vld [vmem:[%s3083_s23 + $0x108] ss:$16 sps:$4 sm:$0xff]   ;;  %v2838_v49 = vld [vmem:[%s3083_s23 + $0x120] ss:$16 sps:$4 sm:$0xff]  }
 0x10c   : > { %2435 = vmatprep.subr.bf16.mxu1 %v1015_v45  ;;  %2547 = vmatprep.subr.bf16.mxu0 %v1031_v46  ;;  %v2839_v50 = vld [vmem:[%s3083_s23 + $0x128] ss:$16 sps:$4 sm:$0xff]   ;;  %v2840_v45 = vld [vmem:[%s3083_s23 + $0x144] ss:$16 sps:$4 sm:$0xff]   ;;  %v2842_v46 = vld [vmem:[%s3083_s23 + $0x14c] ss:$16 sps:$4 sm:$0xff]  }
 0x10d   : > { %2436 = vmatpush3.bf16.msra.mxu1 %v1007_v57  ;;  %2548 = vmatpush3.bf16.msra.mxu0 %v1023_v58 }
 0x10e   : > { %v2683_v55 = vpop.f32.mrb[24].mxu0  ;;  %v2715_v56 = vpop.f32.mrb[24].mxu1  ;;  %2437 = vmatprep.subr.bf16.mxu1 %v1016_v43  ;;  %2549 = vmatprep.subr.bf16.mxu0 %v1032_v44  ;;  %v2834_v43 = vld [vmem:[%s3083_s23 + $0x124] ss:$16 sps:$4 sm:$0xff]   ;;  %v2836_v44 = vld [vmem:[%s3083_s23 + $0x12c] ss:$16 sps:$4 sm:$0xff]  }
 0x10f   : > { %v750_v19 = vpop.f32.mrb[25].mxu0  ;;  %v878_v20 = vpop.f32.mrb[25].mxu1 }
 0x110   : > { %v2684_v21 = vpop.f32.mrb[26].mxu0  ;;  %v2716_v22 = vpop.f32.mrb[26].mxu1 }
 0x111   : > { %v1018_v35 = vpack.c.bf16 %v2684_v21, %v2683_v55  ;;  %v1034_v39 = vpack.c.bf16 %v2716_v22, %v2715_v56  ;;  %v753_v41 = vpop.f32.mrb[27].mxu0  ;;  %v881_v23 = vpop.f32.mrb[27].mxu1  ;;  %2438 = vmatpush3.bf16.msra.mxu1 %v1008_v53  ;;  %2550 = vmatpush3.bf16.msra.mxu0 %v1024_v54  ;;  %v2844_v55 = vld [vmem:[%s3083_s23 + $0x140] ss:$16 sps:$4 sm:$0xff]   ;;  %v2845_v56 = vld [vmem:[%s3083_s23 + $0x148] ss:$16 sps:$4 sm:$0xff]  }
 0x112   : > { %v1017_v36 = vpack.c.bf16 %v753_v41, %v750_v19  ;;  %v1033_v40 = vpack.c.bf16 %v881_v23, %v878_v20  ;;  %v2846_v19 = vld [vmem:[%s3083_s23 + $0x164] ss:$16 sps:$4 sm:$0xff]   ;;  %v2848_v20 = vld [vmem:[%s3083_s23 + $0x16c] ss:$16 sps:$4 sm:$0xff]   ;;  %v2850_v21 = vld [vmem:[%s3083_s23 + $0x160] ss:$16 sps:$4 sm:$0xff]  }
 0x113   : > { %v2851_v22 = vld [vmem:[%s3083_s23 + $0x168] ss:$16 sps:$4 sm:$0xff]   ;;  %v2856_v41 = vld [vmem:[%s3083_s23 + $0x180] ss:$16 sps:$4 sm:$0xff]  }
 0x114   : > { %2439 = vmatprep.subr.bf16.mxu1 %v1017_v36  ;;  %2551 = vmatprep.subr.bf16.mxu0 %v1033_v40  ;;  %v2857_v23 = vld [vmem:[%s3083_s23 + $0x188] ss:$16 sps:$4 sm:$0xff]   ;;  %v2858_v36 = vld [vmem:[%s3083_s23 + $0x1a4] ss:$16 sps:$4 sm:$0xff]   ;;  %v2860_v40 = vld [vmem:[%s3083_s23 + $0x1ac] ss:$16 sps:$4 sm:$0xff]  }
 0x115   : > { %2440 = vmatpush3.bf16.msra.mxu1 %v1009_v5  ;;  %2552 = vmatpush3.bf16.msra.mxu0 %v1025_v6  ;;  %v2794_v5 = vld [vmem:[%s3083_s23 + $0x4c] ss:$16 sps:$4 sm:$0xff]   ;;  %v2796_v6 = vld [vmem:[%s3083_s23 + $0x40] ss:$16 sps:$4 sm:$0xff]  }
 0x116   : > { %v2687_v42 = vpop.f32.mrb[28].mxu0  ;;  %v2719_v57 = vpop.f32.mrb[28].mxu1  ;;  %2441 = vmatprep.subr.bf16.mxu1 %v1018_v35  ;;  %2553 = vmatprep.subr.bf16.mxu0 %v1034_v39  ;;  %v2852_v35 = vld [vmem:[%s3083_s23 + $0x184] ss:$16 sps:$4 sm:$0xff]   ;;  %v2854_v39 = vld [vmem:[%s3083_s23 + $0x18c] ss:$16 sps:$4 sm:$0xff]  }
 0x117   : > { %v766_v47 = vpop.f32.mrb[29].mxu0  ;;  %v894_v51 = vpop.f32.mrb[29].mxu1 }
 0x118   : > { %v2688_v48 = vpop.f32.mrb[30].mxu0  ;;  %v2720_v52 = vpop.f32.mrb[30].mxu1 }
 0x119   : > { %v1020_v53 = vpack.c.bf16 %v2688_v48, %v2687_v42  ;;  %v1036_v54 = vpack.c.bf16 %v2720_v52, %v2719_v57  ;;  %v769_v58 = vpop.f32.mrb[31].mxu0  ;;  %v897_v61 = vpop.f32.mrb[31].mxu1  ;;  %2442 = vmatpush3.bf16.msra.mxu1 %v1010_v1  ;;  %2554 = vmatpush3.bf16.msra.mxu0 %v1026_v2  ;;  %v2790_v1 = vld [vmem:[%s3083_s23 + $0x20] ss:$16 sps:$4 sm:$0xff]   ;;  %v2791_v2 = vld [vmem:[%s3083_s23 + $0x28] ss:$16 sps:$4 sm:$0xff]  }
 0x11a   : > { %v1019_v62 = vpack.c.bf16 %v769_v58, %v766_v47  ;;  %v1035_v3 = vpack.c.bf16 %v897_v61, %v894_v51  ;;  %v2862_v42 = vld [vmem:[%s3083_s23 + $0x1a0] ss:$16 sps:$4 sm:$0xff]   ;;  %v2863_v57 = vld [vmem:[%s3083_s23 + $0x1a8] ss:$16 sps:$4 sm:$0xff]   ;;  %v2864_v47 = vld [vmem:[%s3083_s23 + $0x1c4] ss:$16 sps:$4 sm:$0xff]  }
 0x11b   : > { %v2866_v51 = vld [vmem:[%s3083_s23 + $0x1cc] ss:$16 sps:$4 sm:$0xff]   ;;  %v2868_v48 = vld [vmem:[%s3083_s23 + $0x1c0] ss:$16 sps:$4 sm:$0xff]   ;;  %v2869_v52 = vld [vmem:[%s3083_s23 + $0x1c8] ss:$16 sps:$4 sm:$0xff]  }
 0x11c   : > { %2443 = vmatprep.subr.bf16.mxu1 %v1019_v62  ;;  %2555 = vmatprep.subr.bf16.mxu0 %v1035_v3  ;;  %v2874_v58 = vld [vmem:[%s3083_s23 + $0x1e0] ss:$16 sps:$4 sm:$0xff]   ;;  %v2875_v61 = vld [vmem:[%s3083_s23 + $0x1e8] ss:$16 sps:$4 sm:$0xff]  }
 0x11d   : > { %2444 = vmatpush3.bf16.msra.mxu1 %v1011_v17  ;;  %2556 = vmatpush3.bf16.msra.mxu0 %v1027_v18  ;;  %v2812_v17 = vld [vmem:[%s3083_s23 + $0xac] ss:$16 sps:$4 sm:$0xff]   ;;  %v2814_v18 = vld [vmem:[%s3083_s23 + $0xa0] ss:$16 sps:$4 sm:$0xff]  }
 0x11e   : > { %2445 = vmatprep.subr.bf16.mxu1 %v1020_v53  ;;  %2557 = vmatprep.subr.bf16.mxu0 %v1036_v54  ;;  %v2870_v53 = vld [vmem:[%s3083_s23 + $0x1e4] ss:$16 sps:$4 sm:$0xff]   ;;  %v2872_v54 = vld [vmem:[%s3083_s23 + $0x1ec] ss:$16 sps:$4 sm:$0xff]  }
 0x121   : > { %2446 = vmatpush3.bf16.msra.mxu1 %v1012_v13  ;;  %2558 = vmatpush3.bf16.msra.mxu0 %v1028_v14  ;;  %v2806_v13 = vld [vmem:[%s3083_s23 + $0x8c] ss:$16 sps:$4 sm:$0xff]   ;;  %v2808_v14 = vld [vmem:[%s3083_s23 + $0x80] ss:$16 sps:$4 sm:$0xff]  }
 0x124   : > { %1390 = vmatmul.mubr.bf16.vlgmr.msra.gmra.mrb[32].mxu1 %v2780_v59  ;;  %1551 = vmatmul.mubr.bf16.vlgmr.msra.gmra.mrb[32].mxu0 %v2783_v60 }
 0x125   : > { %1397 = vmatprep.mubr.bf16.mxu1 %v2786_v63  ;;  %1558 = vmatprep.mubr.bf16.mxu0 %v2788_v0 }
 0x12c   : > { %1398 = vmatmul.mubr.bf16.gmra.mrb[36].mxu1 %v2790_v1  ;;  %1559 = vmatmul.mubr.bf16.gmra.mrb[36].mxu0 %v2791_v2 }
 0x12d   : > { %1405 = vmatprep.mubr.bf16.mxu1 %v2792_v4  ;;  %1566 = vmatprep.mubr.bf16.mxu0 %v2794_v5  ;;  %v3266_v4 = vld [vmem:[%s3334_s3] ss:$0 sm:$0xff] }
 0x134   : > { %1406 = vmatmul.mubr.bf16.gmra.mrb[40].mxu1 %v2796_v6  ;;  %1567 = vmatmul.mubr.bf16.gmra.mrb[40].mxu0 %v2797_v7 }
 0x135   : > { %1413 = vmatprep.mubr.bf16.mxu1 %v2798_v8  ;;  %1574 = vmatprep.mubr.bf16.mxu0 %v2800_v9 }
 0x13c   : > { %1414 = vmatmul.mubr.bf16.gmra.mrb[44].mxu1 %v2802_v10  ;;  %1575 = vmatmul.mubr.bf16.gmra.mrb[44].mxu0 %v2803_v11 }
 0x13d   : > { %1421 = vmatprep.mubr.bf16.mxu1 %v2804_v12  ;;  %1582 = vmatprep.mubr.bf16.mxu0 %v2806_v13 }
 0x144   : > { %1422 = vmatmul.mubr.bf16.gmra.mrb[48].mxu1 %v2808_v14  ;;  %1583 = vmatmul.mubr.bf16.gmra.mrb[48].mxu0 %v2809_v15 }
 0x145   : > { %1429 = vmatprep.mubr.bf16.mxu1 %v2810_v16  ;;  %1590 = vmatprep.mubr.bf16.mxu0 %v2812_v17 }
 0x14c   : > { %1430 = vmatmul.mubr.bf16.gmra.mrb[52].mxu1 %v2814_v18  ;;  %1591 = vmatmul.mubr.bf16.gmra.mrb[52].mxu0 %v2815_v24 }
 0x14d   : > { %1437 = vmatprep.mubr.bf16.mxu1 %v2816_v25  ;;  %1598 = vmatprep.mubr.bf16.mxu0 %v2818_v26 }
 0x154   : > { %1438 = vmatmul.mubr.bf16.gmra.mrb[56].mxu1 %v2820_v27  ;;  %1599 = vmatmul.mubr.bf16.gmra.mrb[56].mxu0 %v2821_v28 }
 0x155   : > { %1445 = vmatprep.mubr.bf16.mxu1 %v2822_v29  ;;  %1606 = vmatprep.mubr.bf16.mxu0 %v2824_v30 }
 0x15c   : > { %1446 = vmatmul.mubr.bf16.gmra.mrb[60].mxu1 %v2826_v31  ;;  %1607 = vmatmul.mubr.bf16.gmra.mrb[60].mxu0 %v2827_v32 }
 0x15d   : > { %1453 = vmatprep.mubr.bf16.mxu1 %v2828_v33  ;;  %1614 = vmatprep.mubr.bf16.mxu0 %v2830_v34 }
 0x164   : > { %1454 = vmatmul.mubr.bf16.gmra.mrb[64].mxu1 %v2832_v37  ;;  %1615 = vmatmul.mubr.bf16.gmra.mrb[64].mxu0 %v2833_v38 }
 0x165   : > { %1461 = vmatprep.mubr.bf16.mxu1 %v2834_v43  ;;  %1622 = vmatprep.mubr.bf16.mxu0 %v2836_v44 }
 0x16c   : > { %1462 = vmatmul.mubr.bf16.gmra.mrb[68].mxu1 %v2838_v49  ;;  %1623 = vmatmul.mubr.bf16.gmra.mrb[68].mxu0 %v2839_v50 }
 0x16d   : > { %1469 = vmatprep.mubr.bf16.mxu1 %v2840_v45  ;;  %1630 = vmatprep.mubr.bf16.mxu0 %v2842_v46 }
 0x174   : > { %1470 = vmatmul.mubr.bf16.gmra.mrb[72].mxu1 %v2844_v55  ;;  %1631 = vmatmul.mubr.bf16.gmra.mrb[72].mxu0 %v2845_v56 }
 0x175   : > { %1477 = vmatprep.mubr.bf16.mxu1 %v2846_v19  ;;  %1638 = vmatprep.mubr.bf16.mxu0 %v2848_v20 }
 0x17c   : > { %1478 = vmatmul.mubr.bf16.gmra.mrb[76].mxu1 %v2850_v21  ;;  %1639 = vmatmul.mubr.bf16.gmra.mrb[76].mxu0 %v2851_v22 }
 0x17d   : > { %1485 = vmatprep.mubr.bf16.mxu1 %v2852_v35  ;;  %1646 = vmatprep.mubr.bf16.mxu0 %v2854_v39 }
 0x184   : > { %1486 = vmatmul.mubr.bf16.gmra.mrb[80].mxu1 %v2856_v41  ;;  %1647 = vmatmul.mubr.bf16.gmra.mrb[80].mxu0 %v2857_v23 }
 0x185   : > { %1493 = vmatprep.mubr.bf16.mxu1 %v2858_v36  ;;  %1654 = vmatprep.mubr.bf16.mxu0 %v2860_v40 }
 0x18c   : > { %1494 = vmatmul.mubr.bf16.gmra.mrb[84].mxu1 %v2862_v42  ;;  %1655 = vmatmul.mubr.bf16.gmra.mrb[84].mxu0 %v2863_v57 }
 0x18d   : > { %1501 = vmatprep.mubr.bf16.mxu1 %v2864_v47  ;;  %1662 = vmatprep.mubr.bf16.mxu0 %v2866_v51 }
 0x194   : > { %1502 = vmatmul.mubr.bf16.gmra.mrb[88].mxu1 %v2868_v48  ;;  %1663 = vmatmul.mubr.bf16.gmra.mrb[88].mxu0 %v2869_v52 }
 0x195   : > { %1509 = vmatprep.mubr.bf16.mxu1 %v2870_v53  ;;  %1670 = vmatprep.mubr.bf16.mxu0 %v2872_v54 }
 0x19c   : > { %1510 = vmatmul.mubr.bf16.gmra.mrb[92].mxu1 %v2874_v58  ;;  %1671 = vmatmul.mubr.bf16.gmra.mrb[92].mxu0 %v2875_v61 }
 0x1f7   : > { %v2447_v62 = vpop.f32.mrb[32].mxu1  ;;  %v2559_v3 = vpop.f32.mrb[32].mxu0 }
 0x1f8   : > { %v2448_v59 = vpop.f32.mrb[33].mxu1  ;;  %v2560_v60 = vpop.f32.mrb[33].mxu0 }
 0x1f9   : > { %v2449_v63 = vadd.f32 %v2448_v59, %v2447_v62  ;;  %v2561_v0 = vadd.f32 %v2560_v60, %v2559_v3  ;;  %v2450_v1 = vpop.f32.mrb[34].mxu1  ;;  %v2562_v2 = vpop.f32.mrb[34].mxu0 }
 0x1fa   : > { %v2451_v5 = vpop.f32.mrb[35].mxu1  ;;  %v2563_v6 = vpop.f32.mrb[35].mxu0 }
 0x1fb   : > { %v1553_v7 = vadd.f32 %v2561_v0, %v2449_v63  ;;  %v2452_v8 = vadd.f32 %v2451_v5, %v2450_v1  ;;  %v2564_v9 = vadd.f32 %v2563_v6, %v2562_v2 }
 0x1fd   : > { %v1785_v10 = vadd.f32 %v3266_v4, %v1553_v7  ;;  %v1556_v11 = vadd.f32 %v2564_v9, %v2452_v8 }
 0x1ff   : > { %v1786_v12 = vadd.f32 %v3266_v4, %v1556_v11  ;;  %v2453_v13 = vpop.f32.mrb[36].mxu1  ;;  %v2565_v14 = vpop.f32.mrb[36].mxu0  ;;  %v1817_v17 = vmax.f32 %v1785_v10, 0.0 }
 0x200   : > { %v2454_v15 = vpop.f32.mrb[37].mxu1  ;;  %v2566_v16 = vpop.f32.mrb[37].mxu0 }
 0x201   : > { %v1818_v18 = vmax.f32 %v1786_v12, 0.0  ;;  %v2455_v24 = vadd.f32 %v2454_v15, %v2453_v13  ;;  %v2567_v25 = vadd.f32 %v2566_v16, %v2565_v14  ;;  %v2456_v26 = vpop.f32.mrb[38].mxu1  ;;  %v2568_v27 = vpop.f32.mrb[38].mxu0 }
 0x202   : > { %v2457_v28 = vpop.f32.mrb[39].mxu1  ;;  %v2569_v29 = vpop.f32.mrb[39].mxu0 }
 0x203   : > { %v2306_v30 = vpack.c.bf16 %v1818_v18, %v1817_v17  ;;  %v1561_v31 = vadd.f32 %v2567_v25, %v2455_v24  ;;  %v2458_v32 = vadd.f32 %v2457_v28, %v2456_v26  ;;  %v2570_v33 = vadd.f32 %v2569_v29, %v2568_v27 }
 0x205   : > { %2307 = vst [vmem:[%s3274_s28] sm:$0xff] %v2306_v30   ;;  %v1787_v34 = vadd.f32 %v3266_v4, %v1561_v31  ;;  %v1564_v37 = vadd.f32 %v2570_v33, %v2458_v32 }
 0x207   : > { %v1788_v38 = vadd.f32 %v3266_v4, %v1564_v37  ;;  %v2459_v43 = vpop.f32.mrb[40].mxu1  ;;  %v2571_v44 = vpop.f32.mrb[40].mxu0  ;;  %v1819_v45 = vmax.f32 %v1787_v34, 0.0 }
 0x208   : > { %v2460_v49 = vpop.f32.mrb[41].mxu1  ;;  %v2572_v50 = vpop.f32.mrb[41].mxu0 }
 0x209   : > { %v1820_v46 = vmax.f32 %v1788_v38, 0.0  ;;  %v2461_v55 = vadd.f32 %v2460_v49, %v2459_v43  ;;  %v2573_v56 = vadd.f32 %v2572_v50, %v2571_v44  ;;  %v2462_v19 = vpop.f32.mrb[42].mxu1  ;;  %v2574_v20 = vpop.f32.mrb[42].mxu0 }
 0x20a   : > { %v2463_v21 = vpop.f32.mrb[43].mxu1  ;;  %v2575_v22 = vpop.f32.mrb[43].mxu0 }
 0x20b   : > { %v2311_v35 = vpack.c.bf16 %v1820_v46, %v1819_v45  ;;  %v1569_v39 = vadd.f32 %v2573_v56, %v2461_v55  ;;  %v2464_v41 = vadd.f32 %v2463_v21, %v2462_v19  ;;  %v2576_v23 = vadd.f32 %v2575_v22, %v2574_v20 }
 0x20d   : > { %2383 = vst [vmem:[%s3274_s28 + $0x8] sm:$0xff] %v2311_v35   ;;  %v1789_v36 = vadd.f32 %v3266_v4, %v1569_v39  ;;  %v1572_v40 = vadd.f32 %v2576_v23, %v2464_v41 }
 0x20f   : > { %v1790_v42 = vadd.f32 %v3266_v4, %v1572_v40  ;;  %v2465_v57 = vpop.f32.mrb[44].mxu1  ;;  %v2577_v47 = vpop.f32.mrb[44].mxu0  ;;  %v1821_v52 = vmax.f32 %v1789_v36, 0.0 }
 0x210   : > { %v2466_v51 = vpop.f32.mrb[45].mxu1  ;;  %v2578_v48 = vpop.f32.mrb[45].mxu0 }
 0x211   : > { %v1822_v53 = vmax.f32 %v1790_v42, 0.0  ;;  %v2467_v54 = vadd.f32 %v2466_v51, %v2465_v57  ;;  %v2579_v58 = vadd.f32 %v2578_v48, %v2577_v47  ;;  %v2468_v61 = vpop.f32.mrb[46].mxu1  ;;  %v2580_v62 = vpop.f32.mrb[46].mxu0 }
 0x212   : > { %v2469_v3 = vpop.f32.mrb[47].mxu1  ;;  %v2581_v59 = vpop.f32.mrb[47].mxu0 }
 0x213   : > { %v2316_v60 = vpack.c.bf16 %v1822_v53, %v1821_v52  ;;  %v1577_v63 = vadd.f32 %v2579_v58, %v2467_v54  ;;  %v2470_v0 = vadd.f32 %v2469_v3, %v2468_v61  ;;  %v2582_v1 = vadd.f32 %v2581_v59, %v2580_v62 }
 0x215   : > { %2384 = vst [vmem:[%s3274_s28 + $0x10] sm:$0xff] %v2316_v60   ;;  %v1791_v2 = vadd.f32 %v3266_v4, %v1577_v63  ;;  %v1580_v5 = vadd.f32 %v2582_v1, %v2470_v0 }
 0x217   : > { %v1792_v6 = vadd.f32 %v3266_v4, %v1580_v5  ;;  %v2471_v7 = vpop.f32.mrb[48].mxu1  ;;  %v2583_v8 = vpop.f32.mrb[48].mxu0  ;;  %v1823_v11 = vmax.f32 %v1791_v2, 0.0 }
 0x218   : > { %v2472_v9 = vpop.f32.mrb[49].mxu1  ;;  %v2584_v10 = vpop.f32.mrb[49].mxu0 }
 0x219   : > { %v1824_v12 = vmax.f32 %v1792_v6, 0.0  ;;  %v2473_v13 = vadd.f32 %v2472_v9, %v2471_v7  ;;  %v2585_v14 = vadd.f32 %v2584_v10, %v2583_v8  ;;  %v2474_v15 = vpop.f32.mrb[50].mxu1  ;;  %v2586_v16 = vpop.f32.mrb[50].mxu0 }
 0x21a   : > { %v2475_v17 = vpop.f32.mrb[51].mxu1  ;;  %v2587_v18 = vpop.f32.mrb[51].mxu0 }
 0x21b   : > { %v2321_v24 = vpack.c.bf16 %v1824_v12, %v1823_v11  ;;  %v1585_v25 = vadd.f32 %v2585_v14, %v2473_v13  ;;  %v2476_v26 = vadd.f32 %v2475_v17, %v2474_v15  ;;  %v2588_v27 = vadd.f32 %v2587_v18, %v2586_v16 }
 0x21d   : > { %2385 = vst [vmem:[%s3274_s28 + $0x18] sm:$0xff] %v2321_v24   ;;  %v1793_v28 = vadd.f32 %v3266_v4, %v1585_v25  ;;  %v1588_v29 = vadd.f32 %v2588_v27, %v2476_v26 }
 0x21f   : > { %v1794_v30 = vadd.f32 %v3266_v4, %v1588_v29  ;;  %v2477_v31 = vpop.f32.mrb[52].mxu1  ;;  %v2589_v32 = vpop.f32.mrb[52].mxu0  ;;  %v1825_v37 = vmax.f32 %v1793_v28, 0.0 }
 0x220   : > { %v2478_v33 = vpop.f32.mrb[53].mxu1  ;;  %v2590_v34 = vpop.f32.mrb[53].mxu0 }
 0x221   : > { %v1826_v38 = vmax.f32 %v1794_v30, 0.0  ;;  %v2479_v43 = vadd.f32 %v2478_v33, %v2477_v31  ;;  %v2591_v44 = vadd.f32 %v2590_v34, %v2589_v32  ;;  %v2480_v49 = vpop.f32.mrb[54].mxu1  ;;  %v2592_v50 = vpop.f32.mrb[54].mxu0 }
 0x222   : > { %v2481_v45 = vpop.f32.mrb[55].mxu1  ;;  %v2593_v46 = vpop.f32.mrb[55].mxu0 }
 0x223   : > { %v2326_v55 = vpack.c.bf16 %v1826_v38, %v1825_v37  ;;  %v1593_v56 = vadd.f32 %v2591_v44, %v2479_v43  ;;  %v2482_v19 = vadd.f32 %v2481_v45, %v2480_v49  ;;  %v2594_v20 = vadd.f32 %v2593_v46, %v2592_v50 }
 0x225   : > { %2386 = vst [vmem:[%s3274_s28 + $0x20] sm:$0xff] %v2326_v55   ;;  %v1795_v21 = vadd.f32 %v3266_v4, %v1593_v56  ;;  %v1596_v22 = vadd.f32 %v2594_v20, %v2482_v19 }
 0x227   : > { %v1796_v35 = vadd.f32 %v3266_v4, %v1596_v22  ;;  %v2483_v39 = vpop.f32.mrb[56].mxu1  ;;  %v2595_v41 = vpop.f32.mrb[56].mxu0  ;;  %v1827_v40 = vmax.f32 %v1795_v21, 0.0 }
 0x228   : > { %v2484_v23 = vpop.f32.mrb[57].mxu1  ;;  %v2596_v36 = vpop.f32.mrb[57].mxu0 }
 0x229   : > { %v1828_v42 = vmax.f32 %v1796_v35, 0.0  ;;  %v2485_v57 = vadd.f32 %v2484_v23, %v2483_v39  ;;  %v2597_v47 = vadd.f32 %v2596_v36, %v2595_v41  ;;  %v2486_v51 = vpop.f32.mrb[58].mxu1  ;;  %v2598_v48 = vpop.f32.mrb[58].mxu0 }
 0x22a   : > { %v2487_v52 = vpop.f32.mrb[59].mxu1  ;;  %v2599_v53 = vpop.f32.mrb[59].mxu0 }
 0x22b   : > { %v2331_v54 = vpack.c.bf16 %v1828_v42, %v1827_v40  ;;  %v1601_v58 = vadd.f32 %v2597_v47, %v2485_v57  ;;  %v2488_v61 = vadd.f32 %v2487_v52, %v2486_v51  ;;  %v2600_v62 = vadd.f32 %v2599_v53, %v2598_v48 }
 0x22d   : > { %2387 = vst [vmem:[%s3274_s28 + $0x28] sm:$0xff] %v2331_v54   ;;  %v1797_v3 = vadd.f32 %v3266_v4, %v1601_v58  ;;  %v1604_v59 = vadd.f32 %v2600_v62, %v2488_v61 }
 0x22f   : > { %v1798_v60 = vadd.f32 %v3266_v4, %v1604_v59  ;;  %v2489_v63 = vpop.f32.mrb[60].mxu1  ;;  %v2601_v0 = vpop.f32.mrb[60].mxu0  ;;  %v1829_v5 = vmax.f32 %v1797_v3, 0.0 }
 0x230   : > { %v2490_v1 = vpop.f32.mrb[61].mxu1  ;;  %v2602_v2 = vpop.f32.mrb[61].mxu0 }
 0x231   : > { %v1830_v6 = vmax.f32 %v1798_v60, 0.0  ;;  %v2491_v7 = vadd.f32 %v2490_v1, %v2489_v63  ;;  %v2603_v8 = vadd.f32 %v2602_v2, %v2601_v0  ;;  %v2492_v9 = vpop.f32.mrb[62].mxu1  ;;  %v2604_v10 = vpop.f32.mrb[62].mxu0 }
 0x232   : > { %v2493_v11 = vpop.f32.mrb[63].mxu1  ;;  %v2605_v12 = vpop.f32.mrb[63].mxu0 }
 0x233   : > { %v2336_v13 = vpack.c.bf16 %v1830_v6, %v1829_v5  ;;  %v1609_v14 = vadd.f32 %v2603_v8, %v2491_v7  ;;  %v2494_v15 = vadd.f32 %v2493_v11, %v2492_v9  ;;  %v2606_v16 = vadd.f32 %v2605_v12, %v2604_v10 }
 0x235   : > { %2388 = vst [vmem:[%s3274_s28 + $0x30] sm:$0xff] %v2336_v13   ;;  %v1799_v17 = vadd.f32 %v3266_v4, %v1609_v14  ;;  %v1612_v18 = vadd.f32 %v2606_v16, %v2494_v15 }
 0x237   : > { %v1800_v24 = vadd.f32 %v3266_v4, %v1612_v18  ;;  %v2495_v25 = vpop.f32.mrb[64].mxu1  ;;  %v2607_v26 = vpop.f32.mrb[64].mxu0  ;;  %v1831_v29 = vmax.f32 %v1799_v17, 0.0 }
 0x238   : > { %v2496_v27 = vpop.f32.mrb[65].mxu1  ;;  %v2608_v28 = vpop.f32.mrb[65].mxu0 }
 0x239   : > { %v1832_v30 = vmax.f32 %v1800_v24, 0.0  ;;  %v2497_v31 = vadd.f32 %v2496_v27, %v2495_v25  ;;  %v2609_v32 = vadd.f32 %v2608_v28, %v2607_v26  ;;  %v2498_v33 = vpop.f32.mrb[66].mxu1  ;;  %v2610_v34 = vpop.f32.mrb[66].mxu0 }
 0x23a   : > { %v2499_v37 = vpop.f32.mrb[67].mxu1  ;;  %v2611_v38 = vpop.f32.mrb[67].mxu0 }
 0x23b   : > { %v2341_v43 = vpack.c.bf16 %v1832_v30, %v1831_v29  ;;  %v1617_v44 = vadd.f32 %v2609_v32, %v2497_v31  ;;  %v2500_v49 = vadd.f32 %v2499_v37, %v2498_v33  ;;  %v2612_v50 = vadd.f32 %v2611_v38, %v2610_v34 }
 0x23d   : > { %2389 = vst [vmem:[%s3274_s28 + $0x38] sm:$0xff] %v2341_v43   ;;  %v1801_v45 = vadd.f32 %v3266_v4, %v1617_v44  ;;  %v1620_v46 = vadd.f32 %v2612_v50, %v2500_v49 }
 0x23f   : > { %v1802_v55 = vadd.f32 %v3266_v4, %v1620_v46  ;;  %v2501_v56 = vpop.f32.mrb[68].mxu1  ;;  %v2613_v19 = vpop.f32.mrb[68].mxu0  ;;  %v1833_v22 = vmax.f32 %v1801_v45, 0.0 }
 0x240   : > { %v2502_v20 = vpop.f32.mrb[69].mxu1  ;;  %v2614_v21 = vpop.f32.mrb[69].mxu0 }
 0x241   : > { %v1834_v35 = vmax.f32 %v1802_v55, 0.0  ;;  %v2503_v39 = vadd.f32 %v2502_v20, %v2501_v56  ;;  %v2615_v41 = vadd.f32 %v2614_v21, %v2613_v19  ;;  %v2504_v23 = vpop.f32.mrb[70].mxu1  ;;  %v2616_v36 = vpop.f32.mrb[70].mxu0 }
 0x242   : > { %v2505_v40 = vpop.f32.mrb[71].mxu1  ;;  %v2617_v42 = vpop.f32.mrb[71].mxu0 }
 0x243   : > { %v2346_v57 = vpack.c.bf16 %v1834_v35, %v1833_v22  ;;  %v1625_v47 = vadd.f32 %v2615_v41, %v2503_v39  ;;  %v2506_v51 = vadd.f32 %v2505_v40, %v2504_v23  ;;  %v2618_v48 = vadd.f32 %v2617_v42, %v2616_v36 }
 0x245   : > { %2390 = vst [vmem:[%s3274_s28 + $0x40] sm:$0xff] %v2346_v57   ;;  %v1803_v52 = vadd.f32 %v3266_v4, %v1625_v47  ;;  %v1628_v53 = vadd.f32 %v2618_v48, %v2506_v51 }
 0x247   : > { %v1804_v54 = vadd.f32 %v3266_v4, %v1628_v53  ;;  %v2507_v58 = vpop.f32.mrb[72].mxu1  ;;  %v2619_v61 = vpop.f32.mrb[72].mxu0  ;;  %v1835_v59 = vmax.f32 %v1803_v52, 0.0 }
 0x248   : > { %v2508_v62 = vpop.f32.mrb[73].mxu1  ;;  %v2620_v3 = vpop.f32.mrb[73].mxu0 }
 0x249   : > { %v1836_v60 = vmax.f32 %v1804_v54, 0.0  ;;  %v2509_v63 = vadd.f32 %v2508_v62, %v2507_v58  ;;  %v2621_v0 = vadd.f32 %v2620_v3, %v2619_v61  ;;  %v2510_v1 = vpop.f32.mrb[74].mxu1  ;;  %v2622_v2 = vpop.f32.mrb[74].mxu0 }
 0x24a   : > { %v2511_v5 = vpop.f32.mrb[75].mxu1  ;;  %v2623_v6 = vpop.f32.mrb[75].mxu0 }
 0x24b   : > { %v2351_v7 = vpack.c.bf16 %v1836_v60, %v1835_v59  ;;  %v1633_v8 = vadd.f32 %v2621_v0, %v2509_v63  ;;  %v2512_v9 = vadd.f32 %v2511_v5, %v2510_v1  ;;  %v2624_v10 = vadd.f32 %v2623_v6, %v2622_v2 }
 0x24d   : > { %2391 = vst [vmem:[%s3274_s28 + $0x48] sm:$0xff] %v2351_v7   ;;  %v1805_v11 = vadd.f32 %v3266_v4, %v1633_v8  ;;  %v1636_v12 = vadd.f32 %v2624_v10, %v2512_v9 }
 0x24f   : > { %v1806_v13 = vadd.f32 %v3266_v4, %v1636_v12  ;;  %v2513_v14 = vpop.f32.mrb[76].mxu1  ;;  %v2625_v15 = vpop.f32.mrb[76].mxu0  ;;  %v1837_v18 = vmax.f32 %v1805_v11, 0.0 }
 0x250   : > { %v2514_v16 = vpop.f32.mrb[77].mxu1  ;;  %v2626_v17 = vpop.f32.mrb[77].mxu0 }
 0x251   : > { %v1838_v24 = vmax.f32 %v1806_v13, 0.0  ;;  %v2515_v25 = vadd.f32 %v2514_v16, %v2513_v14  ;;  %v2627_v26 = vadd.f32 %v2626_v17, %v2625_v15  ;;  %v2516_v27 = vpop.f32.mrb[78].mxu1  ;;  %v2628_v28 = vpop.f32.mrb[78].mxu0 }
 0x252   : > { %v2517_v29 = vpop.f32.mrb[79].mxu1  ;;  %v2629_v30 = vpop.f32.mrb[79].mxu0 }
 0x253   : > { %v2356_v31 = vpack.c.bf16 %v1838_v24, %v1837_v18  ;;  %v1641_v32 = vadd.f32 %v2627_v26, %v2515_v25  ;;  %v2518_v33 = vadd.f32 %v2517_v29, %v2516_v27  ;;  %v2630_v34 = vadd.f32 %v2629_v30, %v2628_v28 }
 0x255   : > { %2392 = vst [vmem:[%s3274_s28 + $0x50] sm:$0xff] %v2356_v31   ;;  %v1807_v37 = vadd.f32 %v3266_v4, %v1641_v32  ;;  %v1644_v38 = vadd.f32 %v2630_v34, %v2518_v33 }
 0x257   : > { %v1808_v43 = vadd.f32 %v3266_v4, %v1644_v38  ;;  %v2519_v44 = vpop.f32.mrb[80].mxu1  ;;  %v2631_v49 = vpop.f32.mrb[80].mxu0  ;;  %v1839_v46 = vmax.f32 %v1807_v37, 0.0 }
 0x258   : > { %v2520_v50 = vpop.f32.mrb[81].mxu1  ;;  %v2632_v45 = vpop.f32.mrb[81].mxu0 }
 0x259   : > { %v1840_v55 = vmax.f32 %v1808_v43, 0.0  ;;  %v2521_v56 = vadd.f32 %v2520_v50, %v2519_v44  ;;  %v2633_v19 = vadd.f32 %v2632_v45, %v2631_v49  ;;  %v2522_v20 = vpop.f32.mrb[82].mxu1  ;;  %v2634_v21 = vpop.f32.mrb[82].mxu0 }
 0x25a   : > { %v2523_v22 = vpop.f32.mrb[83].mxu1  ;;  %v2635_v35 = vpop.f32.mrb[83].mxu0 }
 0x25b   : > { %v2361_v39 = vpack.c.bf16 %v1840_v55, %v1839_v46  ;;  %v1649_v41 = vadd.f32 %v2633_v19, %v2521_v56  ;;  %v2524_v23 = vadd.f32 %v2523_v22, %v2522_v20  ;;  %v2636_v36 = vadd.f32 %v2635_v35, %v2634_v21 }
 0x25d   : > { %2393 = vst [vmem:[%s3274_s28 + $0x58] sm:$0xff] %v2361_v39   ;;  %v1809_v40 = vadd.f32 %v3266_v4, %v1649_v41  ;;  %v1652_v42 = vadd.f32 %v2636_v36, %v2524_v23 }
 0x25f   : > { %v1810_v57 = vadd.f32 %v3266_v4, %v1652_v42  ;;  %v2525_v47 = vpop.f32.mrb[84].mxu1  ;;  %v2637_v51 = vpop.f32.mrb[84].mxu0  ;;  %v1841_v53 = vmax.f32 %v1809_v40, 0.0 }
 0x260   : > { %v2526_v48 = vpop.f32.mrb[85].mxu1  ;;  %v2638_v52 = vpop.f32.mrb[85].mxu0 }
 0x261   : > { %v1842_v54 = vmax.f32 %v1810_v57, 0.0  ;;  %v2527_v58 = vadd.f32 %v2526_v48, %v2525_v47  ;;  %v2639_v61 = vadd.f32 %v2638_v52, %v2637_v51  ;;  %v2528_v62 = vpop.f32.mrb[86].mxu1  ;;  %v2640_v3 = vpop.f32.mrb[86].mxu0 }
 0x262   : > { %v2529_v59 = vpop.f32.mrb[87].mxu1  ;;  %v2641_v60 = vpop.f32.mrb[87].mxu0 }
 0x263   : > { %v2366_v63 = vpack.c.bf16 %v1842_v54, %v1841_v53  ;;  %v1657_v0 = vadd.f32 %v2639_v61, %v2527_v58  ;;  %v2530_v1 = vadd.f32 %v2529_v59, %v2528_v62  ;;  %v2642_v2 = vadd.f32 %v2641_v60, %v2640_v3 }
 0x265   : > { %2394 = vst [vmem:[%s3274_s28 + $0x60] sm:$0xff] %v2366_v63   ;;  %v1811_v5 = vadd.f32 %v3266_v4, %v1657_v0  ;;  %v1660_v6 = vadd.f32 %v2642_v2, %v2530_v1 }
 0x267   : > { %v1812_v7 = vadd.f32 %v3266_v4, %v1660_v6  ;;  %v2531_v8 = vpop.f32.mrb[88].mxu1  ;;  %v2643_v9 = vpop.f32.mrb[88].mxu0  ;;  %v1843_v12 = vmax.f32 %v1811_v5, 0.0 }
 0x268   : > { %v2532_v10 = vpop.f32.mrb[89].mxu1  ;;  %v2644_v11 = vpop.f32.mrb[89].mxu0 }
 0x269   : > { %v1844_v13 = vmax.f32 %v1812_v7, 0.0  ;;  %v2533_v14 = vadd.f32 %v2532_v10, %v2531_v8  ;;  %v2645_v15 = vadd.f32 %v2644_v11, %v2643_v9  ;;  %v2534_v16 = vpop.f32.mrb[90].mxu1  ;;  %v2646_v17 = vpop.f32.mrb[90].mxu0 }
 0x26a   : > { %v2535_v18 = vpop.f32.mrb[91].mxu1  ;;  %v2647_v24 = vpop.f32.mrb[91].mxu0 }
 0x26b   : > { %v2371_v25 = vpack.c.bf16 %v1844_v13, %v1843_v12  ;;  %v1665_v26 = vadd.f32 %v2645_v15, %v2533_v14  ;;  %v2536_v27 = vadd.f32 %v2535_v18, %v2534_v16  ;;  %v2648_v28 = vadd.f32 %v2647_v24, %v2646_v17 }
 0x26d   : > { %2395 = vst [vmem:[%s3274_s28 + $0x68] sm:$0xff] %v2371_v25   ;;  %v1813_v29 = vadd.f32 %v3266_v4, %v1665_v26  ;;  %v1668_v30 = vadd.f32 %v2648_v28, %v2536_v27 }
 0x26f   : > { %v1814_v31 = vadd.f32 %v3266_v4, %v1668_v30  ;;  %v2537_v32 = vpop.f32.mrb[92].mxu1  ;;  %v2649_v33 = vpop.f32.mrb[92].mxu0  ;;  %v1845_v38 = vmax.f32 %v1813_v29, 0.0 }
 0x270   : > { %v2538_v34 = vpop.f32.mrb[93].mxu1  ;;  %v2650_v37 = vpop.f32.mrb[93].mxu0 }
 0x271   : > { %v1846_v43 = vmax.f32 %v1814_v31, 0.0  ;;  %v2539_v44 = vadd.f32 %v2538_v34, %v2537_v32  ;;  %v2651_v49 = vadd.f32 %v2650_v37, %v2649_v33  ;;  %v2540_v50 = vpop.f32.mrb[94].mxu1  ;;  %v2652_v45 = vpop.f32.mrb[94].mxu0 }
 0x272   : > { %v2541_v46 = vpop.f32.mrb[95].mxu1  ;;  %v2653_v55 = vpop.f32.mrb[95].mxu0 }
 0x273   : > { %v2376_v56 = vpack.c.bf16 %v1846_v43, %v1845_v38  ;;  %v1673_v19 = vadd.f32 %v2651_v49, %v2539_v44  ;;  %v2542_v20 = vadd.f32 %v2541_v46, %v2540_v50  ;;  %v2654_v21 = vadd.f32 %v2653_v55, %v2652_v45 }
 0x275   : > { %2396 = vst [vmem:[%s3274_s28 + $0x70] sm:$0xff] %v2376_v56   ;;  %v1815_v22 = vadd.f32 %v3266_v4, %v1673_v19  ;;  %v1676_v35 = vadd.f32 %v2654_v21, %v2542_v20 }
 0x277   : > { %v1816_v39 = vadd.f32 %v3266_v4, %v1676_v35  ;;  %v1847_v41 = vmax.f32 %v1815_v22, 0.0 }
 0x279   : > { %v1848_v23 = vmax.f32 %v1816_v39, 0.0 }
 0x27b   : > { %v2381_v36 = vpack.c.bf16 %v1848_v23, %v1847_v41 }
 0x27d   : > { %2397 = vst [vmem:[%s3274_s28 + $0x78] sm:$0xff] %v2381_v36  }
 0x27e PF: > { %s14_s17 = sadd.s32 1, %s2898_s17   ;;  %s3336_s15 = smov %s2894_s16 }
 0x27f   : > { %p11_p5 = scmp.ge.s32.totalorder %s14_s17, 4   ;;  %s3337_s16 = smov %s3339_s18 }
 0x281   :  { %13 = sbr.rel (!%p11_p5) target bundleno = 2 (0x2), region = 77 }

// kernel: simple_gcn_pallas.3
= control target key start
LH: loop header
LB: loop body
LE: loop exit
PB: predicated region body
PF: predicated region fallthrough
CT: control target
= control target key end

     0   :  { %s3005_s24 = smov 0   ;;  %s3007_s25 = smov 0   ;;  %s3595_s0 = inlined_call_operand.vmem [shape: bf16[512,512], index: 0, kind: input, shape index: {}]   ;;  %s3596_s1 = inlined_call_operand.vmem [shape: bf16[512,128], index: 1, kind: input, shape index: {}]   ;;  %s3597_s2 = inlined_call_operand.vmem [shape: bf16[128,128], index: 2, kind: input, shape index: {}]   ;;  %s3598_s3 = inlined_call_operand.vmem [shape: f32[1,128], index: 3, kind: input, shape index: {}]   ;;  %s3599_s4 = inlined_call_operand.vmem [shape: f32[8,512], index: 4, kind: input, shape index: {}]   ;;  %s3600_s5 = inlined_call_operand.vmem [shape: f32[128,128], index: 5, kind: input, shape index: {}]   ;;  %s3601_s6 = inlined_call_operand.vmem [shape: f32[1,128], index: 6, kind: input, shape index: {}]   ;;  %s3602_s7 = inlined_call_operand.vmem [shape: f32[8,128], index: 7, kind: output, shape index: {}]  }
   0x1   :  { %s3009_s26 = smov 0  }
   0x2 LB: > { %s29_s27 = sadd.s32 1, %s2955_s25  ;;  %p2151_p0 = scmp.ge.s32.totalorder %s2959_s26, 1  ;;  %s2959_s26 = sphi %s3009_s26, %s17_s26   ;;  %s2955_s25 = sphi %s3007_s25, %s3604_s25   ;;  %s2951_s24 = sphi %s3005_s24, %s3603_s24  }
   0x3   : > { %p31_p1 = scmp.ge.s32.totalorder %s29_s27, 2  ;;  %p275_p2 = scmp.lt.s32.totalorder %s2959_s26, 3 }
   0x5   : > { %s3606_s27 = smov (%p31_p1, %s29_s27), 0  ;;  %p276_p3 = pnand %p2151_p0, %p275_p2 }
   0x6   : > { %s2152_s28 = sshll.u32 (!%p276_p3), %s2951_s24, 5  ;;  %s2155_s29 = sshll.u32 (!%p276_p3), %s2951_s24, 1 }
   0x7   : > { %279 = sbr.rel (%p276_p3) target bundleno = 1158 (0x486), region = 48  ;;  %p319_p4 = scmp.lt.s32.totalorder (!%p276_p3), %s2152_s28, 63 }
   0x8   : > { %p336_p5 = scmp.lt.s32.totalorder (!%p276_p3), %s2155_s29, 3  ;;  %p342_p6 = scmp.eq.s32.totalorder (!%p276_p3), %s2951_s24, 0 }
   0xe   : > { %s3608_s28 = smov (!%p319_p4, %s2152_s28), 63  ;;  %s3610_s29 = smov (!%p336_p5, %s2155_s29), 3 }
   0xf   : > { %s2267_s30 = sshll.u32 %s3608_s28, 4  ;;  %s2156_s11 = sshll.u32 %s3610_s29, 3  ;;  %v2961_v0 = vmov (%p342_p6), 0.0  }
  0x10   : > { %s3031_s10 = scalar_lea.vmem %s3595_s0, %s2267_s30  ;;  %s3036_s14 = scalar_lea.vmem %s3599_s4, %s2156_s11  ;;  %348 = vst [vmem:[#allocation3] sm:$0xff] (%p342_p6), %v2961_v0 }
  0x11   : > { %347 = sbr.rel (!%p342_p6) target bundleno = 24 (0x18), region = 52 }
  0x18 PF: > { %v2801_v1 = vld [vmem:[%s3597_s2] sm:$0xff]   ;;  %v2802_v2 = vld [vmem:[%s3597_s2 + $0x8] sm:$0xff]   ;;  %v2803_v3 = vld [vmem:[%s3597_s2 + $0x10] sm:$0xff]   ;;  %p1976_p7 = scmp.eq.s32.totalorder %s2951_s24, 1 }
  0x19   : > { %2586 = vmatprep.subr.bf16.mxu0 %v2801_v1  ;;  %2757 = vmatprep.subr.bf16.mxu1 %v2801_v1  ;;  %v2804_v4 = vld [vmem:[%s3597_s2 + $0x18] sm:$0xff]   ;;  %v2809_v5 = vld [vmem:[%s3596_s1] sm:$0xff]   ;;  %v2806_v7 = vld [vmem:[%s3597_s2 + $0x28] sm:$0xff]   ;;  %vm2963_vm0 = vmmov (%p1976_p7), 0  }
  0x1a   : > { %2587 = vmatpush3.bf16.msra.mxu0 %v2801_v1  ;;  %2765 = vmatpush3.bf16.msra.mxu1 %v2801_v1  ;;  %v2805_v6 = vld [vmem:[%s3597_s2 + $0x20] sm:$0xff]   ;;  %v2819_v8 = vld [vmem:[%s3596_s1 + $0x90] sm:$0xff]   ;;  %v2808_v10 = vld [vmem:[%s3597_s2 + $0x38] sm:$0xff]  }
  0x1b   : > { %2588 = vmatprep.subr.bf16.mxu0 %v2802_v2  ;;  %2758 = vmatprep.subr.bf16.mxu1 %v2802_v2  ;;  %v2807_v9 = vld [vmem:[%s3597_s2 + $0x30] sm:$0xff]   ;;  %v2810_v11 = vld [vmem:[%s3596_s1 + $0x8] sm:$0xff]   ;;  %v2820_v13 = vld [vmem:[%s3596_s1 + $0x98] sm:$0xff]  }
  0x1c   : > { %2602 = vmatprep.mubr.bf16.mxu0 %v2809_v5  ;;  %2638 = vmatprep.mubr.bf16.mxu1 %v2819_v8  ;;  %v2811_v12 = vld [vmem:[%s3596_s1 + $0x10] sm:$0xff]   ;;  %v2823_v14 = vld [vmem:[%s3596_s1 + $0xa0] sm:$0xff]   ;;  %v2812_v15 = vld [vmem:[%s3596_s1 + $0x18] sm:$0xff]  }
  0x1d   : > { %v2813_v16 = vld [vmem:[%s3596_s1 + $0x20] sm:$0xff]   ;;  %v2824_v17 = vld [vmem:[%s3596_s1 + $0xa8] sm:$0xff]   ;;  %v2827_v18 = vld [vmem:[%s3596_s1 + $0xb0] sm:$0xff]  }
  0x1e   : > { %2589 = vmatpush3.bf16.msra.mxu0 %v2802_v2  ;;  %2766 = vmatpush3.bf16.msra.mxu1 %v2802_v2  ;;  %v2814_v19 = vld [vmem:[%s3596_s1 + $0x28] sm:$0xff]   ;;  %v2828_v20 = vld [vmem:[%s3596_s1 + $0xb8] sm:$0xff]   ;;  %v2815_v21 = vld [vmem:[%s3596_s1 + $0x30] sm:$0xff]  }
  0x1f   : > { %2590 = vmatprep.subr.bf16.mxu0 %v2803_v3  ;;  %2759 = vmatprep.subr.bf16.mxu1 %v2803_v3  ;;  %v2831_v22 = vld [vmem:[%s3596_s1 + $0xc0] sm:$0xff]   ;;  %v2816_v23 = vld [vmem:[%s3596_s1 + $0x38] sm:$0xff]   ;;  %v2832_v24 = vld [vmem:[%s3596_s1 + $0xc8] sm:$0xff]  }
  0x20   : > { %v2817_v25 = vld [vmem:[%s3596_s1 + $0x40] sm:$0xff]   ;;  %v2835_v26 = vld [vmem:[%s3596_s1 + $0xd0] sm:$0xff]   ;;  %v2818_v27 = vld [vmem:[%s3596_s1 + $0x48] sm:$0xff]  }
  0x21   : > { %v2836_v28 = vld [vmem:[%s3596_s1 + $0xd8] sm:$0xff]   ;;  %v2821_v29 = vld [vmem:[%s3596_s1 + $0x50] sm:$0xff]   ;;  %v2837_v30 = vld [vmem:[%s3596_s1 + $0xe0] sm:$0xff]  }
  0x22   : > { %2591 = vmatpush3.bf16.msra.mxu0 %v2803_v3  ;;  %2767 = vmatpush3.bf16.msra.mxu1 %v2803_v3  ;;  %v2822_v31 = vld [vmem:[%s3596_s1 + $0x58] sm:$0xff]   ;;  %v2838_v32 = vld [vmem:[%s3596_s1 + $0xe8] sm:$0xff]   ;;  %v2825_v33 = vld [vmem:[%s3596_s1 + $0x60] sm:$0xff]  }
  0x23   : > { %2592 = vmatprep.subr.bf16.mxu0 %v2804_v4  ;;  %2760 = vmatprep.subr.bf16.mxu1 %v2804_v4  ;;  %v2839_v34 = vld [vmem:[%s3596_s1 + $0xf0] sm:$0xff]   ;;  %v2826_v35 = vld [vmem:[%s3596_s1 + $0x68] sm:$0xff]   ;;  %v2840_v36 = vld [vmem:[%s3596_s1 + $0xf8] sm:$0xff]  }
  0x24   : > { %v2829_v37 = vld [vmem:[%s3596_s1 + $0x70] sm:$0xff]   ;;  %v2830_v38 = vld [vmem:[%s3596_s1 + $0x78] sm:$0xff]   ;;  %v2833_v39 = vld [vmem:[%s3596_s1 + $0x80] sm:$0xff]  }
  0x25   : > { %v2834_v40 = vld [vmem:[%s3596_s1 + $0x88] sm:$0xff]   ;;  %v2843_v41 = vld [vmem:[%s3031_s10 + $0x4] ss:$16 sps:$4 sm:$0xff]  }
  0x26   : > { %2593 = vmatpush3.bf16.msra.mxu0 %v2804_v4  ;;  %2768 = vmatpush3.bf16.msra.mxu1 %v2804_v4  ;;  %v2846_v42 = vld [vmem:[%s3031_s10 + $0xc] ss:$16 sps:$4 sm:$0xff]  }
  0x27   : > { %2594 = vmatprep.subr.bf16.mxu0 %v2805_v6  ;;  %2761 = vmatprep.subr.bf16.mxu1 %v2805_v6 }
  0x2a   : > { %2595 = vmatpush3.bf16.msra.mxu0 %v2805_v6  ;;  %2769 = vmatpush3.bf16.msra.mxu1 %v2805_v6 }
  0x2b   : > { %2596 = vmatprep.subr.bf16.mxu0 %v2806_v7  ;;  %2762 = vmatprep.subr.bf16.mxu1 %v2806_v7 }
  0x2e   : > { %2597 = vmatpush3.bf16.msra.mxu0 %v2806_v7  ;;  %2770 = vmatpush3.bf16.msra.mxu1 %v2806_v7 }
  0x2f   : > { %2598 = vmatprep.subr.bf16.mxu0 %v2807_v9  ;;  %2763 = vmatprep.subr.bf16.mxu1 %v2807_v9 }
  0x32   : > { %2599 = vmatpush3.bf16.msra.mxu0 %v2807_v9  ;;  %2771 = vmatpush3.bf16.msra.mxu1 %v2807_v9 }
  0x33   : > { %2600 = vmatprep.subr.bf16.mxu0 %v2808_v10  ;;  %2764 = vmatprep.subr.bf16.mxu1 %v2808_v10 }
  0x36   : > { %2601 = vmatpush3.bf16.msra.mxu0 %v2808_v10  ;;  %2772 = vmatpush3.bf16.msra.mxu1 %v2808_v10 }
  0x39   : > { %2603 = vmatmul.mubr.bf16.vlgmr.msra.gmra.mrb[0].mxu0 %v2810_v11  ;;  %2639 = vmatmul.mubr.bf16.vlgmr.msra.gmra.mrb[0].mxu1 %v2820_v13 }
  0x3a   : > { %2606 = vmatprep.mubr.bf16.mxu0 %v2811_v12  ;;  %2642 = vmatprep.mubr.bf16.mxu1 %v2823_v14 }
  0x41   : > { %2607 = vmatmul.mubr.bf16.gmra.mrb[4].mxu0 %v2812_v15  ;;  %2643 = vmatmul.mubr.bf16.gmra.mrb[4].mxu1 %v2824_v17 }
  0x42   : > { %2610 = vmatprep.mubr.bf16.mxu0 %v2813_v16  ;;  %2646 = vmatprep.mubr.bf16.mxu1 %v2827_v18 }
  0x49   : > { %2611 = vmatmul.mubr.bf16.gmra.mrb[8].mxu0 %v2814_v19  ;;  %2647 = vmatmul.mubr.bf16.gmra.mrb[8].mxu1 %v2828_v20 }
  0x4a   : > { %2614 = vmatprep.mubr.bf16.mxu0 %v2815_v21  ;;  %2650 = vmatprep.mubr.bf16.mxu1 %v2831_v22 }
  0x51   : > { %2615 = vmatmul.mubr.bf16.gmra.mrb[12].mxu0 %v2816_v23  ;;  %2651 = vmatmul.mubr.bf16.gmra.mrb[12].mxu1 %v2832_v24 }
  0x52   : > { %2618 = vmatprep.mubr.bf16.mxu0 %v2817_v25  ;;  %2654 = vmatprep.mubr.bf16.mxu1 %v2835_v26 }
  0x59   : > { %2619 = vmatmul.mubr.bf16.gmra.mrb[16].mxu0 %v2818_v27  ;;  %2655 = vmatmul.mubr.bf16.gmra.mrb[16].mxu1 %v2836_v28 }
  0x5a   : > { %2622 = vmatprep.mubr.bf16.mxu0 %v2821_v29  ;;  %2658 = vmatprep.mubr.bf16.mxu1 %v2837_v30 }
  0x61   : > { %2623 = vmatmul.mubr.bf16.gmra.mrb[20].mxu0 %v2822_v31  ;;  %2659 = vmatmul.mubr.bf16.gmra.mrb[20].mxu1 %v2838_v32 }
  0x62   : > { %2626 = vmatprep.mubr.bf16.mxu0 %v2825_v33  ;;  %2662 = vmatprep.mubr.bf16.mxu1 %v2839_v34 }
  0x69   : > { %2627 = vmatmul.mubr.bf16.gmra.mrb[24].mxu0 %v2826_v35  ;;  %2663 = vmatmul.mubr.bf16.gmra.mrb[24].mxu1 %v2840_v36 }
  0x6a   : > { %2630 = vmatprep.mubr.bf16.mxu0 %v2829_v37  ;;  %1473 = vmatprep.mubr.bf16.mxu1 %v2843_v41 }
  0x71   : > { %2631 = vmatmul.mubr.bf16.gmra.mrb[28].mxu0 %v2830_v38 }
  0x72   : > { %2634 = vmatprep.mubr.bf16.mxu0 %v2833_v39 }
  0x79   : > { %2635 = vmatmul.mubr.bf16.gmra.mrb[32].mxu0 %v2834_v40 }
  0x7a   : > { %1634 = vmatprep.mubr.bf16.mxu0 %v2846_v42 }
 0x10c   : > { %v3160_v43 = vpop.f32.mrb[0].mxu0  ;;  %v3162_v44 = vpop.f32.mrb[0].mxu1 }
 0x10d   : > { %v738_v45 = vpop.f32.mrb[1].mxu0  ;;  %v3164_v46 = vpop.f32.mrb[1].mxu1 }
 0x10e   : > { %v3166_v47 = vpop.f32.mrb[2].mxu0  ;;  %v3168_v48 = vpop.f32.mrb[2].mxu1 }
 0x10f   : > { %v1090_v49 = vpack.c.bf16 %v3166_v47, %v3160_v43  ;;  %v741_v50 = vpop.f32.mrb[3].mxu0  ;;  %v1108_v51 = vpack.c.bf16 %v3168_v48, %v3162_v44  ;;  %v3174_v52 = vpop.f32.mrb[3].mxu1  ;;  %v2861_v44 = vld [vmem:[%s3031_s10 + $0x60] ss:$16 sps:$4 sm:$0xff]   ;;  %v2844_v48 = vld [vmem:[%s3031_s10 + $0x8] ss:$16 sps:$4 sm:$0xff]  }
 0x110   : > { %v1089_v53 = vpack.c.bf16 %v741_v50, %v738_v45  ;;  %v1107_v54 = vpack.c.bf16 %v3174_v52, %v3164_v46  ;;  %v2865_v46 = vld [vmem:[%s3031_s10 + $0x84] ss:$16 sps:$4 sm:$0xff]   ;;  %v2867_v52 = vld [vmem:[%s3031_s10 + $0x80] ss:$16 sps:$4 sm:$0xff]  }
 0x114   : > { %v3178_v55 = vpop.f32.mrb[4].mxu0  ;;  %v3180_v56 = vpop.f32.mrb[4].mxu1 }
 0x115   : > { %v3182_v57 = vpop.f32.mrb[5].mxu0  ;;  %v3184_v58 = vpop.f32.mrb[5].mxu1 }
 0x116   : > { %v3186_v59 = vpop.f32.mrb[6].mxu0  ;;  %v3188_v60 = vpop.f32.mrb[6].mxu1 }
 0x117   : > { %v1092_v61 = vpack.c.bf16 %v3186_v59, %v3178_v55  ;;  %v757_v62 = vpop.f32.mrb[7].mxu0  ;;  %v1110_v63 = vpack.c.bf16 %v3188_v60, %v3180_v56  ;;  %v3194_v0 = vpop.f32.mrb[7].mxu1  ;;  %v2852_v56 = vld [vmem:[%s3031_s10 + $0x28] ss:$16 sps:$4 sm:$0xff]   ;;  %v2873_v60 = vld [vmem:[%s3031_s10 + $0xa0] ss:$16 sps:$4 sm:$0xff]  }
 0x118   : > { %v1091_v1 = vpack.c.bf16 %v757_v62, %v3182_v57  ;;  %v1109_v2 = vpack.c.bf16 %v3194_v0, %v3184_v58  ;;  %v2856_v58 = vld [vmem:[%s3031_s10 + $0x4c] ss:$16 sps:$4 sm:$0xff]   ;;  %v2858_v0 = vld [vmem:[%s3031_s10 + $0x48] ss:$16 sps:$4 sm:$0xff]  }
 0x11c   : > { %v3199_v3 = vpop.f32.mrb[8].mxu0  ;;  %v3201_v4 = vpop.f32.mrb[8].mxu1 }
 0x11d   : > { %v3203_v5 = vpop.f32.mrb[9].mxu0  ;;  %v3205_v6 = vpop.f32.mrb[9].mxu1 }
 0x11e   : > { %v3207_v7 = vpop.f32.mrb[10].mxu0  ;;  %v3209_v8 = vpop.f32.mrb[10].mxu1 }
 0x11f   : > { %v1094_v9 = vpack.c.bf16 %v3207_v7, %v3199_v3  ;;  %v3213_v10 = vpop.f32.mrb[11].mxu0  ;;  %v1112_v11 = vpack.c.bf16 %v3209_v8, %v3201_v4  ;;  %v3217_v12 = vpop.f32.mrb[11].mxu1  ;;  %v2849_v7 = vld [vmem:[%s3031_s10 + $0x20] ss:$16 sps:$4 sm:$0xff]   ;;  %v2864_v8 = vld [vmem:[%s3031_s10 + $0x68] ss:$16 sps:$4 sm:$0xff]  }
 0x120   : > { %v1093_v13 = vpack.c.bf16 %v3213_v10, %v3203_v5  ;;  %v1111_v14 = vpack.c.bf16 %v3217_v12, %v3205_v6  ;;  %v2879_v4 = vld [vmem:[%s3031_s10 + $0xc0] ss:$16 sps:$4 sm:$0xff]   ;;  %v2883_v6 = vld [vmem:[%s3031_s10 + $0xe4] ss:$16 sps:$4 sm:$0xff]  }
 0x121   : > { %v2885_v12 = vld [vmem:[%s3031_s10 + $0xe0] ss:$16 sps:$4 sm:$0xff]  }
 0x124   : > { %v3223_v15 = vpop.f32.mrb[12].mxu0  ;;  %v3225_v16 = vpop.f32.mrb[12].mxu1 }
 0x125   : > { %v3227_v17 = vpop.f32.mrb[13].mxu0  ;;  %v930_v18 = vpop.f32.mrb[13].mxu1 }
 0x126   : > { %v3229_v19 = vpop.f32.mrb[14].mxu0  ;;  %v3231_v20 = vpop.f32.mrb[14].mxu1 }
 0x127   : > { %v1096_v21 = vpack.c.bf16 %v3229_v19, %v3223_v15  ;;  %v789_v22 = vpop.f32.mrb[15].mxu0  ;;  %v1114_v23 = vpack.c.bf16 %v3231_v20, %v3225_v16  ;;  %v933_v24 = vpop.f32.mrb[15].mxu1  ;;  %v2855_v15 = vld [vmem:[%s3031_s10 + $0x40] ss:$16 sps:$4 sm:$0xff]   ;;  %v2859_v16 = vld [vmem:[%s3031_s10 + $0x64] ss:$16 sps:$4 sm:$0xff]  }
 0x128   : > { %v1095_v25 = vpack.c.bf16 %v789_v22, %v3227_v17  ;;  %v1113_v26 = vpack.c.bf16 %v933_v24, %v930_v18  ;;  %v2870_v19 = vld [vmem:[%s3031_s10 + $0x88] ss:$16 sps:$4 sm:$0xff]   ;;  %v2874_v20 = vld [vmem:[%s3031_s10 + $0xac] ss:$16 sps:$4 sm:$0xff]  }
 0x12a   : > { %2422 = vmatprep.subr.bf16.mxu0 %v1113_v26 }
 0x12c   : > { %v2620_v27 = vpop.f32.mrb[16].mxu0  ;;  %v3238_v28 = vpop.f32.mrb[16].mxu1 }
 0x12d   : > { %v802_v29 = vpop.f32.mrb[17].mxu0  ;;  %v3240_v30 = vpop.f32.mrb[17].mxu1 }
 0x12e   : > { %v2621_v31 = vpop.f32.mrb[18].mxu0  ;;  %v3242_v32 = vpop.f32.mrb[18].mxu1 }
 0x12f   : > { %v1098_v33 = vpack.c.bf16 %v2621_v31, %v2620_v27  ;;  %v805_v34 = vpop.f32.mrb[19].mxu0  ;;  %v1116_v35 = vpack.c.bf16 %v3242_v32, %v3238_v28  ;;  %v3246_v36 = vpop.f32.mrb[19].mxu1  ;;  %v2880_v28 = vld [vmem:[%s3031_s10 + $0xcc] ss:$16 sps:$4 sm:$0xff]   ;;  %v2899_v32 = vld [vmem:[%s3031_s10 + $0x120] ss:$16 sps:$4 sm:$0xff]  }
 0x130   : > { %v1097_v37 = vpack.c.bf16 %v805_v34, %v802_v29  ;;  %v1115_v38 = vpack.c.bf16 %v3246_v36, %v3240_v30 }
 0x132   : > { %2310 = vmatprep.subr.bf16.mxu1 %v1097_v37 }
 0x133   : > { %2311 = vmatpush3.bf16.msra.mxu1 %v1089_v53 }
 0x134   : > { %v2624_v39 = vpop.f32.mrb[20].mxu0  ;;  %2312 = vmatprep.subr.bf16.mxu1 %v1098_v33  ;;  %v3250_v40 = vpop.f32.mrb[20].mxu1 }
 0x135   : > { %v818_v41 = vpop.f32.mrb[21].mxu0  ;;  %v962_v42 = vpop.f32.mrb[21].mxu1 }
 0x136   : > { %v2625_v45 = vpop.f32.mrb[22].mxu0  ;;  %v3252_v50 = vpop.f32.mrb[22].mxu1 }
 0x137   : > { %v1100_v57 = vpack.c.bf16 %v2625_v45, %v2624_v39  ;;  %v821_v62 = vpop.f32.mrb[23].mxu0  ;;  %2313 = vmatpush3.bf16.msra.mxu1 %v1090_v49  ;;  %v1118_v5 = vpack.c.bf16 %v3252_v50, %v3250_v40  ;;  %v965_v10 = vpop.f32.mrb[23].mxu1  ;;  %v2841_v40 = vld [vmem:[%s3031_s10] ss:$16 sps:$4 sm:$0xff]   ;;  %v2847_v45 = vld [vmem:[%s3031_s10 + $0x24] ss:$16 sps:$4 sm:$0xff]  }
 0x138   : > { %v1099_v53 = vpack.c.bf16 %v821_v62, %v818_v41  ;;  %v1117_v17 = vpack.c.bf16 %v965_v10, %v962_v42  ;;  %v2886_v50 = vld [vmem:[%s3031_s10 + $0xec] ss:$16 sps:$4 sm:$0xff]   ;;  %v2907_v62 = vld [vmem:[%s3031_s10 + $0x164] ss:$16 sps:$4 sm:$0xff]  }
 0x139   : > { %v2892_v10 = vld [vmem:[%s3031_s10 + $0x10c] ss:$16 sps:$4 sm:$0xff]  }
 0x13a   : > { %2314 = vmatprep.subr.bf16.mxu1 %v1099_v53  ;;  %v2911_v53 = vld [vmem:[%s3031_s10 + $0x160] ss:$16 sps:$4 sm:$0xff]  }
 0x13b   : > { %2315 = vmatpush3.bf16.msra.mxu1 %v1091_v1 }
 0x13c   : > { %v2628_v18 = vpop.f32.mrb[24].mxu0  ;;  %2316 = vmatprep.subr.bf16.mxu1 %v1100_v57  ;;  %v2664_v22 = vpop.f32.mrb[24].mxu1  ;;  %v2905_v57 = vld [vmem:[%s3031_s10 + $0x140] ss:$16 sps:$4 sm:$0xff]  }
 0x13d   : > { %v834_v24 = vpop.f32.mrb[25].mxu0  ;;  %v978_v26 = vpop.f32.mrb[25].mxu1 }
 0x13e   : > { %v2629_v27 = vpop.f32.mrb[26].mxu0  ;;  %v2665_v29 = vpop.f32.mrb[26].mxu1 }
 0x13f   : > { %v1102_v30 = vpack.c.bf16 %v2629_v27, %v2628_v18  ;;  %v837_v31 = vpop.f32.mrb[27].mxu0  ;;  %2317 = vmatpush3.bf16.msra.mxu1 %v1092_v61  ;;  %v1120_v43 = vpack.c.bf16 %v2665_v29, %v2664_v22  ;;  %v981_v47 = vpop.f32.mrb[27].mxu1  ;;  %v2894_v18 = vld [vmem:[%s3031_s10 + $0x108] ss:$16 sps:$4 sm:$0xff]   ;;  %v2897_v22 = vld [vmem:[%s3031_s10 + $0x12c] ss:$16 sps:$4 sm:$0xff]  }
 0x140   : > { %v1101_v49 = vpack.c.bf16 %v837_v31, %v834_v24  ;;  %v1119_v33 = vpack.c.bf16 %v981_v47, %v978_v26  ;;  %v2917_v24 = vld [vmem:[%s3031_s10 + $0x180] ss:$16 sps:$4 sm:$0xff]   ;;  %v2919_v26 = vld [vmem:[%s3031_s10 + $0x1a4] ss:$16 sps:$4 sm:$0xff]   ;;  %v2900_v27 = vld [vmem:[%s3031_s10 + $0x128] ss:$16 sps:$4 sm:$0xff]  }
 0x141   : > { %v2903_v29 = vld [vmem:[%s3031_s10 + $0x14c] ss:$16 sps:$4 sm:$0xff]   ;;  %v2925_v31 = vld [vmem:[%s3031_s10 + $0x1c4] ss:$16 sps:$4 sm:$0xff]  }
 0x142   : > { %2318 = vmatprep.subr.bf16.mxu1 %v1101_v49  ;;  %v2909_v47 = vld [vmem:[%s3031_s10 + $0x16c] ss:$16 sps:$4 sm:$0xff]   ;;  %v2929_v49 = vld [vmem:[%s3031_s10 + $0x1c0] ss:$16 sps:$4 sm:$0xff]  }
 0x143   : > { %2319 = vmatpush3.bf16.msra.mxu1 %v1093_v13 }
 0x144   : > { %v2632_v1 = vpop.f32.mrb[28].mxu0  ;;  %2320 = vmatprep.subr.bf16.mxu1 %v1102_v30  ;;  %v2923_v30 = vld [vmem:[%s3031_s10 + $0x1a0] ss:$16 sps:$4 sm:$0xff]  }
 0x145   : > { %v850_v34 = vpop.f32.mrb[29].mxu0 }
 0x146   : > { %v2633_v36 = vpop.f32.mrb[30].mxu0 }
 0x147   : > { %v1104_v37 = vpack.c.bf16 %v2633_v36, %v2632_v1  ;;  %v853_v39 = vpop.f32.mrb[31].mxu0  ;;  %2321 = vmatpush3.bf16.msra.mxu1 %v1094_v9  ;;  %v2853_v9 = vld [vmem:[%s3031_s10 + $0x44] ss:$16 sps:$4 sm:$0xff]   ;;  %v2912_v1 = vld [vmem:[%s3031_s10 + $0x168] ss:$16 sps:$4 sm:$0xff]  }
 0x148   : > { %v1103_v55 = vpack.c.bf16 %v853_v39, %v850_v34  ;;  %v2915_v34 = vld [vmem:[%s3031_s10 + $0x18c] ss:$16 sps:$4 sm:$0xff]   ;;  %v2935_v36 = vld [vmem:[%s3031_s10 + $0x1e0] ss:$16 sps:$4 sm:$0xff]  }
 0x149   : > { %v2921_v39 = vld [vmem:[%s3031_s10 + $0x1ac] ss:$16 sps:$4 sm:$0xff]  }
 0x14a   : > { %2322 = vmatprep.subr.bf16.mxu1 %v1103_v55  ;;  %v2924_v55 = vld [vmem:[%s3031_s10 + $0x1a8] ss:$16 sps:$4 sm:$0xff]  }
 0x14b   : > { %2323 = vmatpush3.bf16.msra.mxu1 %v1095_v25  ;;  %v2876_v25 = vld [vmem:[%s3031_s10 + $0xa8] ss:$16 sps:$4 sm:$0xff]  }
 0x14c   : > { %v2636_v59 = vpop.f32.mrb[32].mxu0  ;;  %2324 = vmatprep.subr.bf16.mxu1 %v1104_v37  ;;  %v2918_v37 = vld [vmem:[%s3031_s10 + $0x188] ss:$16 sps:$4 sm:$0xff]  }
 0x14d   : > { %v866_v61 = vpop.f32.mrb[33].mxu0 }
 0x14e   : > { %v2637_v13 = vpop.f32.mrb[34].mxu0 }
 0x14f   : > { %v1106_v41 = vpack.c.bf16 %v2637_v13, %v2636_v59  ;;  %v869_v42 = vpop.f32.mrb[35].mxu0  ;;  %2325 = vmatpush3.bf16.msra.mxu1 %v1096_v21  ;;  %v2891_v21 = vld [vmem:[%s3031_s10 + $0x100] ss:$16 sps:$4 sm:$0xff]   ;;  %v2927_v59 = vld [vmem:[%s3031_s10 + $0x1cc] ss:$16 sps:$4 sm:$0xff]  }
 0x150   : > { %v1105_v3 = vpack.c.bf16 %v869_v42, %v866_v61  ;;  %v2930_v61 = vld [vmem:[%s3031_s10 + $0x1c8] ss:$16 sps:$4 sm:$0xff]   ;;  %v2933_v13 = vld [vmem:[%s3031_s10 + $0x1ec] ss:$16 sps:$4 sm:$0xff]  }
 0x152   : > { %2423 = vmatpush3.bf16.msra.mxu0 %v1105_v3  ;;  %1474 = vmatmul.mubr.bf16.vlgmr.msra.gmra.mrb[28].mxu1 %v2841_v40  ;;  %v2936_v40 = vld [vmem:[%s3031_s10 + $0x1e8] ss:$16 sps:$4 sm:$0xff]  }
 0x153   : > { %2424 = vmatprep.subr.bf16.mxu0 %v1114_v23  ;;  %1481 = vmatprep.mubr.bf16.mxu1 %v2847_v45  ;;  %v2895_v23 = vld [vmem:[%s3031_s10 + $0x124] ss:$16 sps:$4 sm:$0xff]  }
 0x156   : > { %2425 = vmatpush3.bf16.msra.mxu0 %v1106_v41 }
 0x157   : > { %2426 = vmatprep.subr.bf16.mxu0 %v1115_v38  ;;  %v2882_v38 = vld [vmem:[%s3031_s10 + $0xc8] ss:$16 sps:$4 sm:$0xff]  }
 0x15a   : > { %2427 = vmatpush3.bf16.msra.mxu0 %v1107_v54  ;;  %1482 = vmatmul.mubr.bf16.gmra.mrb[32].mxu1 %v2849_v7  ;;  %v2871_v54 = vld [vmem:[%s3031_s10 + $0xa4] ss:$16 sps:$4 sm:$0xff]  }
 0x15b   : > { %2428 = vmatprep.subr.bf16.mxu0 %v1116_v35  ;;  %1489 = vmatprep.mubr.bf16.mxu1 %v2853_v9  ;;  %v2901_v35 = vld [vmem:[%s3031_s10 + $0x144] ss:$16 sps:$4 sm:$0xff]  }
 0x15e   : > { %2429 = vmatpush3.bf16.msra.mxu0 %v1108_v51  ;;  %v2850_v51 = vld [vmem:[%s3031_s10 + $0x2c] ss:$16 sps:$4 sm:$0xff]  }
 0x15f   : > { %2430 = vmatprep.subr.bf16.mxu0 %v1117_v17  ;;  %v2913_v17 = vld [vmem:[%s3031_s10 + $0x184] ss:$16 sps:$4 sm:$0xff]  }
 0x162   : > { %2431 = vmatpush3.bf16.msra.mxu0 %v1109_v2  ;;  %1490 = vmatmul.mubr.bf16.gmra.mrb[36].mxu1 %v2855_v15  ;;  %v2862_v2 = vld [vmem:[%s3031_s10 + $0x6c] ss:$16 sps:$4 sm:$0xff]  }
 0x163   : > { %2432 = vmatprep.subr.bf16.mxu0 %v1118_v5  ;;  %1497 = vmatprep.mubr.bf16.mxu1 %v2859_v16  ;;  %v2888_v5 = vld [vmem:[%s3031_s10 + $0xe8] ss:$16 sps:$4 sm:$0xff]  }
 0x166   : > { %2433 = vmatpush3.bf16.msra.mxu0 %v1110_v63  ;;  %v2877_v63 = vld [vmem:[%s3031_s10 + $0xc4] ss:$16 sps:$4 sm:$0xff]  }
 0x167   : > { %2434 = vmatprep.subr.bf16.mxu0 %v1119_v33  ;;  %v2931_v33 = vld [vmem:[%s3031_s10 + $0x1e4] ss:$16 sps:$4 sm:$0xff]  }
 0x16a   : > { %2435 = vmatpush3.bf16.msra.mxu0 %v1111_v14  ;;  %1498 = vmatmul.mubr.bf16.gmra.mrb[40].mxu1 %v2861_v44  ;;  %v2889_v14 = vld [vmem:[%s3031_s10 + $0x104] ss:$16 sps:$4 sm:$0xff]  }
 0x16b   : > { %2436 = vmatprep.subr.bf16.mxu0 %v1120_v43  ;;  %1505 = vmatprep.mubr.bf16.mxu1 %v2865_v46  ;;  %v2906_v43 = vld [vmem:[%s3031_s10 + $0x148] ss:$16 sps:$4 sm:$0xff]  }
 0x16e   : > { %2437 = vmatpush3.bf16.msra.mxu0 %v1112_v11  ;;  %v2868_v11 = vld [vmem:[%s3031_s10 + $0x8c] ss:$16 sps:$4 sm:$0xff]  }
 0x171   : > { %1635 = vmatmul.mubr.bf16.vlgmr.msra.gmra.mrb[36].mxu0 %v2844_v48 }
 0x172   : > { %1642 = vmatprep.mubr.bf16.mxu0 %v2850_v51  ;;  %1506 = vmatmul.mubr.bf16.gmra.mrb[44].mxu1 %v2867_v52 }
 0x173   : > { %1513 = vmatprep.mubr.bf16.mxu1 %v2871_v54 }
 0x179   : > { %1643 = vmatmul.mubr.bf16.gmra.mrb[40].mxu0 %v2852_v56 }
 0x17a   : > { %1650 = vmatprep.mubr.bf16.mxu0 %v2856_v58  ;;  %1514 = vmatmul.mubr.bf16.gmra.mrb[48].mxu1 %v2873_v60 }
 0x17b   : > { %1521 = vmatprep.mubr.bf16.mxu1 %v2877_v63 }
 0x181   : > { %1651 = vmatmul.mubr.bf16.gmra.mrb[44].mxu0 %v2858_v0 }
 0x182   : > { %1658 = vmatprep.mubr.bf16.mxu0 %v2862_v2  ;;  %1522 = vmatmul.mubr.bf16.gmra.mrb[52].mxu1 %v2879_v4 }
 0x183   : > { %1529 = vmatprep.mubr.bf16.mxu1 %v2883_v6 }
 0x189   : > { %1659 = vmatmul.mubr.bf16.gmra.mrb[48].mxu0 %v2864_v8 }
 0x18a   : > { %1666 = vmatprep.mubr.bf16.mxu0 %v2868_v11  ;;  %1530 = vmatmul.mubr.bf16.gmra.mrb[56].mxu1 %v2885_v12 }
 0x18b   : > { %1537 = vmatprep.mubr.bf16.mxu1 %v2889_v14 }
 0x191   : > { %1667 = vmatmul.mubr.bf16.gmra.mrb[52].mxu0 %v2870_v19 }
 0x192   : > { %1674 = vmatprep.mubr.bf16.mxu0 %v2874_v20  ;;  %1538 = vmatmul.mubr.bf16.gmra.mrb[60].mxu1 %v2891_v21 }
 0x193   : > { %1545 = vmatprep.mubr.bf16.mxu1 %v2895_v23 }
 0x199   : > { %1675 = vmatmul.mubr.bf16.gmra.mrb[56].mxu0 %v2876_v25 }
 0x19a   : > { %1682 = vmatprep.mubr.bf16.mxu0 %v2880_v28  ;;  %1546 = vmatmul.mubr.bf16.gmra.mrb[64].mxu1 %v2899_v32 }
 0x19b   : > { %1553 = vmatprep.mubr.bf16.mxu1 %v2901_v35 }
 0x1a1   : > { %1683 = vmatmul.mubr.bf16.gmra.mrb[60].mxu0 %v2882_v38 }
 0x1a2   : > { %1690 = vmatprep.mubr.bf16.mxu0 %v2886_v50  ;;  %1554 = vmatmul.mubr.bf16.gmra.mrb[68].mxu1 %v2905_v57  ;;  %v3363_v57 = vld [vmem:[%s3598_s3] ss:$0 sm:$0xff] }
 0x1a3   : > { %1561 = vmatprep.mubr.bf16.mxu1 %v2907_v62 }
 0x1a9   : > { %1691 = vmatmul.mubr.bf16.gmra.mrb[64].mxu0 %v2888_v5  ;;  %v1903_v5 = vld [vmem:[%s3036_s14 + $0x8] sm:$0xff] }
 0x1aa   : > { %1698 = vmatprep.mubr.bf16.mxu0 %v2892_v10  ;;  %1562 = vmatmul.mubr.bf16.gmra.mrb[72].mxu1 %v2911_v53 }
 0x1ab   : > { %1569 = vmatprep.mubr.bf16.mxu1 %v2913_v17 }
 0x1b1   : > { %1699 = vmatmul.mubr.bf16.gmra.mrb[68].mxu0 %v2894_v18 }
 0x1b2   : > { %1706 = vmatprep.mubr.bf16.mxu0 %v2897_v22  ;;  %1570 = vmatmul.mubr.bf16.gmra.mrb[76].mxu1 %v2917_v24 }
 0x1b3   : > { %1577 = vmatprep.mubr.bf16.mxu1 %v2919_v26 }
 0x1b9   : > { %1707 = vmatmul.mubr.bf16.gmra.mrb[72].mxu0 %v2900_v27 }
 0x1ba   : > { %1714 = vmatprep.mubr.bf16.mxu0 %v2903_v29  ;;  %1578 = vmatmul.mubr.bf16.gmra.mrb[80].mxu1 %v2923_v30 }
 0x1bb   : > { %1585 = vmatprep.mubr.bf16.mxu1 %v2925_v31 }
 0x1c1   : > { %1715 = vmatmul.mubr.bf16.gmra.mrb[76].mxu0 %v2906_v43 }
 0x1c2   : > { %1722 = vmatprep.mubr.bf16.mxu0 %v2909_v47  ;;  %1586 = vmatmul.mubr.bf16.gmra.mrb[84].mxu1 %v2929_v49 }
 0x1c3   : > { %1593 = vmatprep.mubr.bf16.mxu1 %v2931_v33 }
 0x1c9   : > { %1723 = vmatmul.mubr.bf16.gmra.mrb[80].mxu0 %v2912_v1 }
 0x1ca   : > { %1730 = vmatprep.mubr.bf16.mxu0 %v2915_v34  ;;  %1594 = vmatmul.mubr.bf16.gmra.mrb[88].mxu1 %v2935_v36 }
 0x1cb   : > { %1968 = vmatprep.mubr.f32.mxu1 %v1903_v5 }
 0x1d1   : > { %1731 = vmatmul.mubr.bf16.gmra.mrb[84].mxu0 %v2918_v37 }
 0x1d2   : > { %1738 = vmatprep.mubr.bf16.mxu0 %v2921_v39 }
 0x1d9   : > { %1739 = vmatmul.mubr.bf16.gmra.mrb[88].mxu0 %v2924_v55 }
 0x1da   : > { %1746 = vmatprep.mubr.bf16.mxu0 %v2927_v59 }
 0x1e1   : > { %1747 = vmatmul.mubr.bf16.gmra.mrb[92].mxu0 %v2930_v61 }
 0x1e2   : > { %1754 = vmatprep.mubr.bf16.mxu0 %v2933_v13 }
 0x1e9   : > { %1755 = vmatmul.mubr.bf16.gmra.mrb[96].mxu0 %v2936_v40 }
 0x225   : > { %v2326_v41 = vpop.f32.mrb[28].mxu1 }
 0x226   : > { %v2327_v42 = vpop.f32.mrb[29].mxu1 }
 0x227   : > { %v2328_v45 = vadd.f32 %v2327_v42, %v2326_v41  ;;  %v2329_v3 = vpop.f32.mrb[30].mxu1 }
 0x228   : > { %v2330_v7 = vpop.f32.mrb[31].mxu1 }
 0x229   : > { %v2331_v9 = vadd.f32 %v2330_v7, %v2329_v3 }
 0x22d   : > { %v2332_v15 = vpop.f32.mrb[32].mxu1 }
 0x22e   : > { %v2333_v16 = vpop.f32.mrb[33].mxu1 }
 0x22f   : > { %v2334_v44 = vadd.f32 %v2333_v16, %v2332_v15  ;;  %v2335_v46 = vpop.f32.mrb[34].mxu1 }
 0x230   : > { %v2336_v48 = vpop.f32.mrb[35].mxu1 }
 0x231   : > { %v2337_v51 = vadd.f32 %v2336_v48, %v2335_v46 }
 0x235   : > { %v2338_v52 = vpop.f32.mrb[36].mxu1 }
 0x236   : > { %v2339_v54 = vpop.f32.mrb[37].mxu1 }
 0x237   : > { %v2340_v56 = vadd.f32 %v2339_v54, %v2338_v52  ;;  %v2341_v58 = vpop.f32.mrb[38].mxu1 }
 0x238   : > { %v2342_v60 = vpop.f32.mrb[39].mxu1 }
 0x239   : > { %v2343_v63 = vadd.f32 %v2342_v60, %v2341_v58 }
 0x23d   : > { %v2344_v0 = vpop.f32.mrb[40].mxu1 }
 0x23e   : > { %v2345_v2 = vpop.f32.mrb[41].mxu1 }
 0x23f   : > { %v3354_v4 = vadd.f32 %v2345_v2, %v2344_v0  ;;  %v2347_v6 = vpop.f32.mrb[42].mxu1 }
 0x240   : > { %v2348_v8 = vpop.f32.mrb[43].mxu1 }
 0x241   : > { %v3356_v11 = vadd.f32 %v2348_v8, %v2347_v6 }
 0x244   : > { %v2438_v12 = vpop.f32.mrb[36].mxu0 }
 0x245   : > { %v2439_v14 = vpop.f32.mrb[37].mxu0  ;;  %v2350_v19 = vpop.f32.mrb[44].mxu1 }
 0x246   : > { %v2440_v20 = vadd.f32 %v2439_v14, %v2438_v12  ;;  %v2441_v21 = vpop.f32.mrb[38].mxu0  ;;  %v2351_v23 = vpop.f32.mrb[45].mxu1 }
 0x247   : > { %v2442_v25 = vpop.f32.mrb[39].mxu0  ;;  %v3358_v28 = vadd.f32 %v2351_v23, %v2350_v19  ;;  %v2353_v32 = vpop.f32.mrb[46].mxu1 }
 0x248   : > { %v1637_v35 = vadd.f32 %v2440_v20, %v2328_v45  ;;  %v2443_v38 = vadd.f32 %v2442_v25, %v2441_v21  ;;  %v2354_v50 = vpop.f32.mrb[47].mxu1 }
 0x249   : > { %v3365_v62 = vadd.f32 %v2354_v50, %v2353_v32 }
 0x24a   : > { %v1640_v10 = vadd.f32 %v2443_v38, %v2331_v9  ;;  %v3369_v53 = vadd.f32 %v3363_v57, %v1637_v35 }
 0x24c   : > { %v3372_v17 = vadd.f32 %v3363_v57, %v1640_v10  ;;  %v2444_v18 = vpop.f32.mrb[40].mxu0 }
 0x24d   : > { %v2445_v22 = vpop.f32.mrb[41].mxu0  ;;  %v2356_v24 = vpop.f32.mrb[48].mxu1 }
 0x24e   : > { %v2703_v26 = vpack.c.bf16 %v3372_v17, %v3369_v53  ;;  %v2446_v27 = vadd.f32 %v2445_v22, %v2444_v18  ;;  %v2447_v29 = vpop.f32.mrb[42].mxu0  ;;  %v2357_v30 = vpop.f32.mrb[49].mxu1 }
 0x24f   : > { %v2448_v31 = vpop.f32.mrb[43].mxu0  ;;  %v3376_v43 = vadd.f32 %v2357_v30, %v2356_v24  ;;  %v2359_v47 = vpop.f32.mrb[50].mxu1 }
 0x250   : > { %v1645_v49 = vadd.f32 %v2446_v27, %v2334_v44  ;;  %v2449_v33 = vadd.f32 %v2448_v31, %v2447_v29  ;;  %v2360_v1 = vpop.f32.mrb[51].mxu1 }
 0x251   : > { %v3378_v34 = vadd.f32 %v2360_v1, %v2359_v47 }
 0x252   : > { %v1648_v36 = vadd.f32 %v2449_v33, %v2337_v51  ;;  %v3381_v37 = vadd.f32 %v3363_v57, %v1645_v49 }
 0x254   : > { %v3384_v39 = vadd.f32 %v3363_v57, %v1648_v36  ;;  %v2450_v55 = vpop.f32.mrb[44].mxu0 }
 0x255   : > { %v2451_v59 = vpop.f32.mrb[45].mxu0  ;;  %v2362_v61 = vpop.f32.mrb[52].mxu1 }
 0x256   : > { %v2707_v13 = vpack.c.bf16 %v3384_v39, %v3381_v37  ;;  %v2452_v40 = vadd.f32 %v2451_v59, %v2450_v55  ;;  %v2453_v41 = vpop.f32.mrb[46].mxu0  ;;  %v2363_v42 = vpop.f32.mrb[53].mxu1 }
 0x257   : > { %v2454_v45 = vpop.f32.mrb[47].mxu0  ;;  %v3388_v3 = vadd.f32 %v2363_v42, %v2362_v61  ;;  %v2365_v7 = vpop.f32.mrb[54].mxu1 }
 0x258   : > { %v1653_v9 = vadd.f32 %v2452_v40, %v2340_v56  ;;  %v2455_v15 = vadd.f32 %v2454_v45, %v2453_v41  ;;  %v2366_v16 = vpop.f32.mrb[55].mxu1 }
 0x259   : > { %v3390_v44 = vadd.f32 %v2366_v16, %v2365_v7 }
 0x25a   : > { %v1656_v46 = vadd.f32 %v2455_v15, %v2343_v63  ;;  %v3393_v48 = vadd.f32 %v3363_v57, %v1653_v9 }
 0x25c   : > { %v3396_v51 = vadd.f32 %v3363_v57, %v1656_v46  ;;  %v2456_v52 = vpop.f32.mrb[48].mxu0 }
 0x25d   : > { %v2457_v54 = vpop.f32.mrb[49].mxu0  ;;  %v2368_v58 = vpop.f32.mrb[56].mxu1 }
 0x25e   : > { %v2711_v60 = vpack.c.bf16 %v3396_v51, %v3393_v48  ;;  %v2458_v0 = vadd.f32 %v2457_v54, %v2456_v52  ;;  %v2459_v2 = vpop.f32.mrb[50].mxu0  ;;  %v2369_v56 = vpop.f32.mrb[57].mxu1 }
 0x25f   : > { %v2460_v6 = vpop.f32.mrb[51].mxu0  ;;  %v3400_v8 = vadd.f32 %v2369_v56, %v2368_v58  ;;  %v2371_v12 = vpop.f32.mrb[58].mxu1 }
 0x260   : > { %v1661_v63 = vadd.f32 %v2458_v0, %v3354_v4  ;;  %v2461_v14 = vadd.f32 %v2460_v6, %v2459_v2  ;;  %v2372_v19 = vpop.f32.mrb[59].mxu1 }
 0x261   : > { %v3403_v20 = vadd.f32 %v2372_v19, %v2371_v12 }
 0x262   : > { %v1664_v21 = vadd.f32 %v2461_v14, %v3356_v11  ;;  %v3407_v23 = vadd.f32 %v3363_v57, %v1661_v63 }
 0x264   : > { %v3410_v25 = vadd.f32 %v3363_v57, %v1664_v21  ;;  %v2462_v32 = vpop.f32.mrb[52].mxu0 }
 0x265   : > { %v2463_v35 = vpop.f32.mrb[53].mxu0  ;;  %v2374_v38 = vpop.f32.mrb[60].mxu1 }
 0x266   : > { %v2715_v50 = vpack.c.bf16 %v3410_v25, %v3407_v23  ;;  %v2464_v5 = vadd.f32 %v2463_v35, %v2462_v32  ;;  %v2465_v4 = vpop.f32.mrb[54].mxu0  ;;  %v2375_v10 = vpop.f32.mrb[61].mxu1 }
 0x267   : > { %v2466_v18 = vpop.f32.mrb[55].mxu0  ;;  %v3414_v22 = vadd.f32 %v2375_v10, %v2374_v38  ;;  %v2377_v24 = vpop.f32.mrb[62].mxu1 }
 0x268   : > { %v1669_v11 = vadd.f32 %v2464_v5, %v3358_v28  ;;  %v2467_v27 = vadd.f32 %v2466_v18, %v2465_v4  ;;  %v2378_v29 = vpop.f32.mrb[63].mxu1 }
 0x269   : > { %v3417_v30 = vadd.f32 %v2378_v29, %v2377_v24 }
 0x26a   : > { %v1672_v31 = vadd.f32 %v2467_v27, %v3365_v62  ;;  %v3421_v47 = vadd.f32 %v3363_v57, %v1669_v11 }
 0x26c   : > { %v3424_v49 = vadd.f32 %v3363_v57, %v1672_v31  ;;  %v2468_v33 = vpop.f32.mrb[56].mxu0 }
 0x26d   : > { %v2469_v1 = vpop.f32.mrb[57].mxu0  ;;  %v2380_v36 = vpop.f32.mrb[64].mxu1 }
 0x26e   : > { %v2719_v55 = vpack.c.bf16 %v3424_v49, %v3421_v47  ;;  %v2470_v59 = vadd.f32 %v2469_v1, %v2468_v33  ;;  %v2471_v28 = vpop.f32.mrb[58].mxu0  ;;  %v2381_v61 = vpop.f32.mrb[65].mxu1 }
 0x26f   : > { %v2472_v40 = vpop.f32.mrb[59].mxu0  ;;  %v3428_v41 = vadd.f32 %v2381_v61, %v2380_v36  ;;  %v2383_v42 = vpop.f32.mrb[66].mxu1 }
 0x270   : > { %v1677_v62 = vadd.f32 %v2470_v59, %v3376_v43  ;;  %v2473_v45 = vadd.f32 %v2472_v40, %v2471_v28  ;;  %v2384_v7 = vpop.f32.mrb[67].mxu1 }
 0x271   : > { %v3431_v9 = vadd.f32 %v2384_v7, %v2383_v42 }
 0x272   : > { %v1680_v15 = vadd.f32 %v2473_v45, %v3378_v34  ;;  %v3435_v16 = vadd.f32 %v3363_v57, %v1677_v62 }
 0x274   : > { %v3438_v46 = vadd.f32 %v3363_v57, %v1680_v15  ;;  %v2474_v52 = vpop.f32.mrb[60].mxu0 }
 0x275   : > { %v2475_v54 = vpop.f32.mrb[61].mxu0  ;;  %v2386_v58 = vpop.f32.mrb[68].mxu1 }
 0x276   : > { %v2723_v0 = vpack.c.bf16 %v3438_v46, %v3435_v16  ;;  %v2476_v2 = vadd.f32 %v2475_v54, %v2474_v52  ;;  %v2477_v43 = vpop.f32.mrb[62].mxu0  ;;  %v2387_v56 = vpop.f32.mrb[69].mxu1 }
 0x277   : > { %v2478_v6 = vpop.f32.mrb[63].mxu0  ;;  %v3442_v12 = vadd.f32 %v2387_v56, %v2386_v58  ;;  %v2389_v63 = vpop.f32.mrb[70].mxu1 }
 0x278   : > { %v1685_v34 = vadd.f32 %v2476_v2, %v3388_v3  ;;  %v2479_v14 = vadd.f32 %v2478_v6, %v2477_v43  ;;  %v2390_v19 = vpop.f32.mrb[71].mxu1 }
 0x279   : > { %v3445_v21 = vadd.f32 %v2390_v19, %v2389_v63 }
 0x27a   : > { %v1688_v32 = vadd.f32 %v2479_v14, %v3390_v44  ;;  %v3449_v35 = vadd.f32 %v3363_v57, %v1685_v34 }
 0x27c   : > { %v3452_v38 = vadd.f32 %v3363_v57, %v1688_v32  ;;  %v2480_v5 = vpop.f32.mrb[64].mxu0 }
 0x27d   : > { %v2481_v4 = vpop.f32.mrb[65].mxu0  ;;  %v2392_v10 = vpop.f32.mrb[72].mxu1 }
 0x27e   : > { %v2727_v18 = vpack.c.bf16 %v3452_v38, %v3449_v35  ;;  %v2482_v24 = vadd.f32 %v2481_v4, %v2480_v5  ;;  %v2483_v3 = vpop.f32.mrb[66].mxu0  ;;  %v2393_v11 = vpop.f32.mrb[73].mxu1  ;;  %v1984_v38 = vld [vmem:[%s3600_s5 + $0x8] sm:$0xff] (%p1976_p7) }
 0x27f   : > { %v2484_v27 = vpop.f32.mrb[67].mxu0  ;;  %v3456_v29 = vadd.f32 %v2393_v11, %v2392_v10  ;;  %v2395_v31 = vpop.f32.mrb[74].mxu1 }
 0x280   : > { %v1693_v44 = vadd.f32 %v2482_v24, %v3400_v8  ;;  %v2485_v33 = vadd.f32 %v2484_v27, %v2483_v3  ;;  %v2396_v1 = vpop.f32.mrb[75].mxu1 }
 0x281   : > { %v3459_v36 = vadd.f32 %v2396_v1, %v2395_v31 }
 0x282   : > { %v1696_v59 = vadd.f32 %v2485_v33, %v3403_v20  ;;  %v3463_v28 = vadd.f32 %v3363_v57, %v1693_v44 }
 0x284   : > { %v3466_v61 = vadd.f32 %v3363_v57, %v1696_v59  ;;  %v2486_v40 = vpop.f32.mrb[68].mxu0 }
 0x285   : > { %v2487_v42 = vpop.f32.mrb[69].mxu0  ;;  %v2398_v62 = vpop.f32.mrb[76].mxu1 }
 0x286   : > { %v2731_v45 = vpack.c.bf16 %v3466_v61, %v3463_v28  ;;  %v2488_v7 = vadd.f32 %v2487_v42, %v2486_v40  ;;  %v2489_v8 = vpop.f32.mrb[70].mxu0  ;;  %v2399_v15 = vpop.f32.mrb[77].mxu1  ;;  %v2962_v28 = vmov (%p1976_p7), 0.0|0.0  }
 0x287   : > { %v2490_v52 = vpop.f32.mrb[71].mxu0  ;;  %v3470_v54 = vadd.f32 %v2399_v15, %v2398_v62  ;;  %v2401_v58 = vpop.f32.mrb[78].mxu1  ;;  %2733 = vmatprep.subr.bf16.mxu0 (%p1976_p7), %v2962_v28 }
 0x288   : > { %v1701_v20 = vadd.f32 %v2488_v7, %v3414_v22  ;;  %v2491_v2 = vadd.f32 %v2490_v52, %v2489_v8  ;;  %v2402_v43 = vpop.f32.mrb[79].mxu1 }
 0x289   : > { %v3473_v56 = vadd.f32 %v2402_v43, %v2401_v58 }
 0x28a   : > { %v1704_v6 = vadd.f32 %v2491_v2, %v3417_v30  ;;  %v1885_v63 = vadd.f32 %v3363_v57, %v1701_v20 }
 0x28c   : > { %v1886_v34 = vadd.f32 %v3363_v57, %v1704_v6  ;;  %v2492_v14 = vpop.f32.mrb[72].mxu0 }
 0x28d   : > { %v2493_v19 = vpop.f32.mrb[73].mxu0  ;;  %v2404_v32 = vpop.f32.mrb[80].mxu1 }
 0x28e   : > { %v2494_v5 = vadd.f32 %v2493_v19, %v2492_v14  ;;  %v2495_v4 = vpop.f32.mrb[74].mxu0  ;;  %v2701_v10 = vpack.c.bf16 %v1886_v34, %v1885_v63  ;;  %v2405_v24 = vpop.f32.mrb[81].mxu1 }
 0x28f   : > { %v2496_v3 = vpop.f32.mrb[75].mxu0  ;;  %v3478_v11 = vadd.f32 %v2405_v24, %v2404_v32  ;;  %v2407_v22 = vpop.f32.mrb[82].mxu1 }
 0x290   : > { %v1709_v27 = vadd.f32 %v2494_v5, %v3428_v41  ;;  %v2497_v31 = vadd.f32 %v2496_v3, %v2495_v4  ;;  %2702 = vmatprep.subr.bf16.mxu1 %v2701_v10  ;;  %v2408_v30 = vpop.f32.mrb[83].mxu1 }
 0x291   : > { %2704 = vmatpush3.bf16.msra.mxu1 %v2703_v26  ;;  %v3484_v44 = vadd.f32 %v2408_v30, %v2407_v22 }
 0x292   : > { %v1712_v33 = vadd.f32 %v2497_v31, %v3431_v9  ;;  %v1887_v1 = vadd.f32 %v3363_v57, %v1709_v27 }
 0x294   : > { %v1888_v59 = vadd.f32 %v3363_v57, %v1712_v33  ;;  %v2498_v40 = vpop.f32.mrb[76].mxu0 }
 0x295   : > { %v2499_v42 = vpop.f32.mrb[77].mxu0  ;;  %v2410_v62 = vpop.f32.mrb[84].mxu1 }
 0x296   : > { %v2500_v7 = vadd.f32 %v2499_v42, %v2498_v40  ;;  %v2501_v41 = vpop.f32.mrb[78].mxu0  ;;  %v2705_v8 = vpack.c.bf16 %v1888_v59, %v1887_v1  ;;  %v2411_v15 = vpop.f32.mrb[85].mxu1 }
 0x297   : > { %v2502_v52 = vpop.f32.mrb[79].mxu0  ;;  %v2412_v58 = vadd.f32 %v2411_v15, %v2410_v62  ;;  %v2413_v20 = vpop.f32.mrb[86].mxu1 }
 0x298   : > { %v1717_v53 = vadd.f32 %v2500_v7, %v3442_v12  ;;  %v2503_v17 = vadd.f32 %v2502_v52, %v2501_v41  ;;  %2706 = vmatprep.subr.bf16.mxu1 %v2705_v8  ;;  %v2414_v26 = vpop.f32.mrb[87].mxu1 }
 0x299   : > { %2708 = vmatpush3.bf16.msra.mxu1 %v2707_v13  ;;  %v2415_v9 = vadd.f32 %v2414_v26, %v2413_v20 }
 0x29a   : > { %v1720_v2 = vadd.f32 %v2503_v17, %v3445_v21  ;;  %v1889_v43 = vadd.f32 %v3363_v57, %v1717_v53 }
 0x29c   : > { %v1890_v6 = vadd.f32 %v3363_v57, %v1720_v2  ;;  %v2504_v63 = vpop.f32.mrb[80].mxu0 }
 0x29d   : > { %v2505_v34 = vpop.f32.mrb[81].mxu0  ;;  %v2416_v14 = vpop.f32.mrb[88].mxu1 }
 0x29e   : > { %v2506_v19 = vadd.f32 %v2505_v34, %v2504_v63  ;;  %v2507_v32 = vpop.f32.mrb[82].mxu0  ;;  %v2709_v12 = vpack.c.bf16 %v1890_v6, %v1889_v43  ;;  %v2417_v5 = vpop.f32.mrb[89].mxu1 }
 0x29f   : > { %v2508_v4 = vpop.f32.mrb[83].mxu0  ;;  %v2418_v10 = vadd.f32 %v2417_v5, %v2416_v14  ;;  %v2419_v24 = vpop.f32.mrb[90].mxu1 }
 0x2a0   : > { %v1725_v37 = vadd.f32 %v2506_v19, %v3456_v29  ;;  %v2509_v39 = vadd.f32 %v2508_v4, %v2507_v32  ;;  %2710 = vmatprep.subr.bf16.mxu1 %v2709_v12  ;;  %v2420_v13 = vpop.f32.mrb[91].mxu1  ;;  %v1902_v12 = vld [vmem:[%s3036_s14] sm:$0xff] }
 0x2a1   : > { %2712 = vmatpush3.bf16.msra.mxu1 %v2711_v60  ;;  %v2421_v21 = vadd.f32 %v2420_v13, %v2419_v24  ;;  %v1901_v4 = vld [vmem:[#allocation3] sm:$0xff] }
 0x2a2   : > { %v1728_v3 = vadd.f32 %v2509_v39, %v3459_v36  ;;  %v1891_v22 = vadd.f32 %v3363_v57, %v1725_v37  ;;  %v2964_v37 = vmov (%p1976_p7), 0.0   ;;  %v1987_v13 = vld [vmem:[%s3600_s5 + $0x20] sm:$0xff] (%p1976_p7) }
 0x2a3   : > { %2698 = vmatprep.mubr.msk.f32.mxu0 (%p1976_p7), %vm2963_vm0, %v2964_v37 }
 0x2a4   : > { %v1892_v27 = vadd.f32 %v3363_v57, %v1728_v3  ;;  %v2510_v31 = vpop.f32.mrb[84].mxu0 }
 0x2a5   : > { %v2511_v30 = vpop.f32.mrb[85].mxu0 }
 0x2a6   : > { %v2512_v33 = vadd.f32 %v2511_v30, %v2510_v31  ;;  %v2513_v1 = vpop.f32.mrb[86].mxu0  ;;  %v2713_v59 = vpack.c.bf16 %v1892_v27, %v1891_v22  ;;  %v1989_v22 = vld [vmem:[%s3600_s5 + $0x30] sm:$0xff] (%p1976_p7)  ;;  %v1990_v27 = vld [vmem:[%s3600_s5 + $0x38] sm:$0xff] (%p1976_p7)  ;;  %v1991_v30 = vld [vmem:[%s3600_s5 + $0x40] sm:$0xff] (%p1976_p7) }
 0x2a7   : > { %v2514_v29 = vpop.f32.mrb[87].mxu0  ;;  %v2743_v31 = vpack.c.bf16 (%p1976_p7), %v1990_v27, %v1989_v22 }
 0x2a8   : > { %v1733_v40 = vadd.f32 %v2512_v33, %v3470_v54  ;;  %v2515_v42 = vadd.f32 %v2514_v29, %v2513_v1  ;;  %2714 = vmatprep.subr.bf16.mxu1 %v2713_v59  ;;  %v1992_v33 = vld [vmem:[%s3600_s5 + $0x48] sm:$0xff] (%p1976_p7)  ;;  %v1993_v59 = vld [vmem:[%s3600_s5 + $0x50] sm:$0xff] (%p1976_p7)  ;;  %v1994_v29 = vld [vmem:[%s3600_s5 + $0x58] sm:$0xff] (%p1976_p7) }
 0x2a9   : > { %2716 = vmatpush3.bf16.msra.mxu1 %v2715_v50  ;;  %v2746_v1 = vpack.c.bf16 (%p1976_p7), %v1992_v33, %v1991_v30 }
 0x2aa   : > { %v1736_v48 = vadd.f32 %v2515_v42, %v3473_v56  ;;  %v1893_v51 = vadd.f32 %v3363_v57, %v1733_v40  ;;  %v2749_v40 = vpack.c.bf16 (%p1976_p7), %v1994_v29, %v1993_v59  ;;  %v1995_v42 = vld [vmem:[%s3600_s5 + $0x60] sm:$0xff] (%p1976_p7) }
 0x2ac   : > { %v1894_v60 = vadd.f32 %v3363_v57, %v1736_v48  ;;  %v2516_v36 = vpop.f32.mrb[88].mxu0  ;;  %v1996_v48 = vld [vmem:[%s3600_s5 + $0x68] sm:$0xff] (%p1976_p7) }
 0x2ad   : > { %v2517_v62 = vpop.f32.mrb[89].mxu0 }
 0x2ae   : > { %v2518_v7 = vadd.f32 %v2517_v62, %v2516_v36  ;;  %v2519_v41 = vpop.f32.mrb[90].mxu0  ;;  %v2717_v8 = vpack.c.bf16 %v1894_v60, %v1893_v51  ;;  %v2752_v51 = vpack.c.bf16 (%p1976_p7), %v1996_v48, %v1995_v42  ;;  %v1997_v60 = vld [vmem:[%s3600_s5 + $0x70] sm:$0xff] (%p1976_p7)  ;;  %v1998_v36 = vld [vmem:[%s3600_s5 + $0x78] sm:$0xff] (%p1976_p7) }
 0x2af   : > { %v2520_v15 = vpop.f32.mrb[91].mxu0  ;;  %v2755_v62 = vpack.c.bf16 (%p1976_p7), %v1998_v36, %v1997_v60 }
 0x2b0   : > { %v1741_v54 = vadd.f32 %v2518_v7, %v3478_v11  ;;  %v2521_v52 = vadd.f32 %v2520_v15, %v2519_v41  ;;  %2718 = vmatprep.subr.bf16.mxu1 %v2717_v8  ;;  %v2264_v8 = vld [vmem:[%s3601_s6] ss:$0 sm:$0xff] (%p1976_p7) }
 0x2b1   : > { %2720 = vmatpush3.bf16.msra.mxu1 %v2719_v55 }
 0x2b2   : > { %v1744_v23 = vadd.f32 %v2521_v52, %v3484_v44  ;;  %v1895_v25 = vadd.f32 %v3363_v57, %v1741_v54 }
 0x2b4   : > { %v1896_v50 = vadd.f32 %v3363_v57, %v1744_v23  ;;  %v2522_v56 = vpop.f32.mrb[92].mxu0 }
 0x2b5   : > { %v2523_v20 = vpop.f32.mrb[93].mxu0 }
 0x2b6   : > { %v2524_v53 = vadd.f32 %v2523_v20, %v2522_v56  ;;  %v2525_v17 = vpop.f32.mrb[94].mxu0  ;;  %v2721_v26 = vpack.c.bf16 %v1896_v50, %v1895_v25 }
 0x2b7   : > { %v2526_v2 = vpop.f32.mrb[95].mxu0 }
 0x2b8   : > { %v1749_v43 = vadd.f32 %v2524_v53, %v2412_v58  ;;  %v2527_v11 = vadd.f32 %v2526_v2, %v2525_v17  ;;  %2722 = vmatprep.subr.bf16.mxu1 %v2721_v26 }
 0x2b9   : > { %2724 = vmatpush3.bf16.msra.mxu1 %v2723_v0 }
 0x2ba   : > { %v1752_v47 = vadd.f32 %v2527_v11, %v2415_v9  ;;  %v1897_v49 = vadd.f32 %v3363_v57, %v1749_v43 }
 0x2bc   : > { %v1898_v55 = vadd.f32 %v3363_v57, %v1752_v47  ;;  %v2528_v44 = vpop.f32.mrb[96].mxu0 }
 0x2bd   : > { %v2529_v6 = vpop.f32.mrb[97].mxu0 }
 0x2be   : > { %v2530_v63 = vadd.f32 %v2529_v6, %v2528_v44  ;;  %v2531_v34 = vpop.f32.mrb[98].mxu0  ;;  %v2725_v14 = vpack.c.bf16 %v1898_v55, %v1897_v49 }
 0x2bf   : > { %v2532_v19 = vpop.f32.mrb[99].mxu0 }
 0x2c0   : > { %v1757_v58 = vadd.f32 %v2530_v63, %v2418_v10  ;;  %v2533_v32 = vadd.f32 %v2532_v19, %v2531_v34  ;;  %2726 = vmatprep.subr.bf16.mxu1 %v2725_v14 }
 0x2c1   : > { %2728 = vmatpush3.bf16.msra.mxu1 %v2727_v18  ;;  %v1985_v18 = vld [vmem:[%s3600_s5 + $0x10] sm:$0xff] (%p1976_p7) }
 0x2c2   : > { %v1760_v16 = vadd.f32 %v2533_v32, %v2421_v21  ;;  %v1899_v46 = vadd.f32 %v3363_v57, %v1757_v58  ;;  %v1988_v21 = vld [vmem:[%s3600_s5 + $0x28] sm:$0xff] (%p1976_p7) }
 0x2c3   : > { %v2740_v3 = vpack.c.bf16 (%p1976_p7), %v1988_v21, %v1987_v13 }
 0x2c4   : > { %v1900_v0 = vadd.f32 %v3363_v57, %v1760_v16  ;;  %v1983_v57 = vld [vmem:[%s3600_s5] sm:$0xff] (%p1976_p7) }
 0x2c5   : > { %v2734_v61 = vpack.c.bf16 (%p1976_p7), %v1984_v38, %v1983_v57 }
 0x2c6   : > { %v2729_v9 = vpack.c.bf16 %v1900_v0, %v1899_v46 }
 0x2c7   : > { %2735 = vmatpush3.bf16.msra.mxu0 (%p1976_p7), %v2734_v61 }
 0x2c8   : > { %2730 = vmatprep.subr.bf16.mxu1 %v2729_v9  ;;  %2736 = vmatprep.subr.bf16.mxu0 (%p1976_p7), %v2962_v28 }
 0x2c9   : > { %2732 = vmatpush3.bf16.msra.mxu1 %v2731_v45  ;;  %v1986_v45 = vld [vmem:[%s3600_s5 + $0x18] sm:$0xff] (%p1976_p7) }
 0x2ca   : > { %v2737_v39 = vpack.c.bf16 (%p1976_p7), %v1986_v45, %v1985_v18 }
 0x2cc   : > { %1969 = vmatmul.mubr.f32.vlgmr.msra.gmra.mrb[92].mxu1 %v1902_v12  ;;  %2738 = vmatpush3.bf16.msra.mxu0 (%p1976_p7), %v2737_v39 }
 0x2cd   : > { %2739 = vmatprep.subr.bf16.mxu0 (%p1976_p7), %v2962_v28 }
 0x2d0   : > { %2741 = vmatpush3.bf16.msra.mxu0 (%p1976_p7), %v2740_v3 }
 0x2d1   : > { %2742 = vmatprep.subr.bf16.mxu0 (%p1976_p7), %v2962_v28 }
 0x2d4   : > { %2744 = vmatpush3.bf16.msra.mxu0 (%p1976_p7), %v2743_v31 }
 0x2d5   : > { %2745 = vmatprep.subr.bf16.mxu0 (%p1976_p7), %v2962_v28 }
 0x2d8   : > { %2747 = vmatpush3.bf16.msra.mxu0 (%p1976_p7), %v2746_v1 }
 0x2d9   : > { %2748 = vmatprep.subr.bf16.mxu0 (%p1976_p7), %v2962_v28 }
 0x2dc   : > { %2750 = vmatpush3.bf16.msra.mxu0 (%p1976_p7), %v2749_v40 }
 0x2dd   : > { %2751 = vmatprep.subr.bf16.mxu0 (%p1976_p7), %v2962_v28 }
 0x2e0   : > { %2753 = vmatpush3.bf16.msra.mxu0 (%p1976_p7), %v2752_v51 }
 0x2e1   : > { %2754 = vmatprep.subr.bf16.mxu0 (%p1976_p7), %v2962_v28 }
 0x2e4   : > { %2756 = vmatpush3.bf16.msra.mxu0 (%p1976_p7), %v2755_v62 }
 0x39f   : > { %v2566_v5 = vpop.f32.mrb[92].mxu1  ;;  %1980 = sbr.rel (!%p1976_p7) target bundleno = 1158 (0x486), region = 64 }
 0x3a0   : > { %v2567_v10 = vpop.f32.mrb[93].mxu1 }
 0x3a1   : > { %v2568_v24 = vadd.f32 %v2567_v10, %v2566_v5 }
 0x3a3   : > { %v1974_v35 = vadd.f32 %v2568_v24, %v1901_v4 }
 0x3a5   : > { %1975 = vst [vmem:[#allocation3] sm:$0xff] %v1974_v35 }
 0x3ac   : > { %v1981_v7 = vld [vmem:[#allocation3] sm:$0xff] }
 0x3ad   : > { %v1982_v41 = vmax.f32 %v1981_v7, 0.0 }
 0x3af   : > { %2699 = vmatmul.mubr.f32.vlgmr.msra.gmra.mrb[0].mxu0 %v1982_v41 }
 0x482   : > { %v2072_v15 = vpop.f32.mrb[0].mxu0 }
 0x483   : > { %v2073_v54 = vadd.f32 %v2264_v8, %v2072_v15  ;;  %v2700_v52 = vpop.f32.mrb[1].mxu0 }
 0x485   : > { %2076 = vst [vmem:[%s3602_s7] sm:$0xff] %v2073_v54 }
 0x486 PF: > { %s17_s26 = sadd.s32 1, %s2959_s26   ;;  %s3603_s24 = smov %s2955_s25 }
 0x487   : > { %p14_p8 = scmp.ge.s32.totalorder %s17_s26, 4   ;;  %s3604_s25 = smov %s3606_s27 }
 0x489   :  { %16 = sbr.rel (!%p14_p8) target bundleno = 2 (0x2), region = 96 }

</bundles_post_ra>
